<compile_context>
chip_gen: v6e
topology: v6e:2x2x1
jax: 0.10.0
libtpu: 0.0.40
codegen_flags: <defaults>
</compile_context>

<pallas_src>
import functools

import jax
import jax.numpy as jnp
import numpy as np
from jax import lax
from jax.experimental import pallas as pl
from jax.experimental.pallas import tpu as pltpu

EPS = 1e-5


# --------------------------------------------------------------------------------------
# In-kernel helpers
# --------------------------------------------------------------------------------------
def _conv3x3_vpu(x, mask, wT, b, *, width):
    """3x3 SAME conv on a channels-major, lane-dense block.

    x    : (C, M) f32, M = NB*H*W  (lane axis = flattened batch+spatial, dense)
    mask : (9, M) f32, per-tap validity mask (0 where the tap would read padding)
    wT   : (C, 9*C) f32, wT[co, t*C+ci] = w_torch[co, ci, dy+1, dx+1], t=(dy+1)*3+(dx+1)
    b    : (C, 1) f32
    returns (C, M) f32 (exact f32 accumulation on the VPU; MXU unused at these channel counts).
    """
    C, M = x.shape
    y = jnp.zeros((C, M), jnp.float32)
    t = 0
    for dy in (-1, 0, 1):
        for dx in (-1, 0, 1):
            k = dy * width + dx
            if k == 0:
                tap = x                                   # centre tap: always valid
            else:
                # tap[q] = x[(q + k) mod M]; wrapped lanes are exactly the masked ones.
                tap = pltpu.roll(x, (-k) % M, axis=1) * mask[t:t + 1, :]
            for ci in range(C):
                col = t * C + ci
                y = y + wT[:, col:col + 1] * tap[ci:ci + 1, :]
            t += 1
    return y + b


def _bn_affine(stats, gamma, beta, inv_count):
    """Fold global batch statistics into a per-channel affine (scale, shift).

    stats : (G, C, 2) per-block (sum, sumsq); gamma/beta : (C, 1).
    """
    s = jnp.sum(stats, axis=0)                 # (C, 2)
    mean = s[:, 0:1] * inv_count               # (C, 1)
    var = s[:, 1:2] * inv_count - mean * mean  # biased variance (train-mode BN)
    sc = gamma * lax.rsqrt(var + EPS)
    sh = beta - mean * sc
    return sc, sh


def _write_stats(stats_ref, y):
    """Per-block channel sum / sum-of-squares (lane reduction -> XLU)."""
    stats_ref[0, :, 0:1] = jnp.sum(y, axis=1, keepdims=True)
    stats_ref[0, :, 1:2] = jnp.sum(y * y, axis=1, keepdims=True)


# --------------------------------------------------------------------------------------
# Stage kernels
# --------------------------------------------------------------------------------------
def _stage1_kernel(x_ref, mask_ref, w_ref, b_ref, y_ref, stats_ref, *, width):
    # conv1 on one image block + per-block BN1 partial statistics.
    y = _conv3x3_vpu(x_ref[...], mask_ref[...], w_ref[...], b_ref[...], width=width)
    y_ref[...] = y
    _write_stats(stats_ref, y)


def _stage2_kernel(y1_ref, st1_ref, g1_ref, be1_ref, alpha_ref, mask_ref, w_ref, b_ref,
                   y2_ref, stats_ref, *, width, inv_count):
    # BN1 (global batch stats folded in-kernel) + PReLU + conv2 + per-block BN2 stats.
    sc, sh = _bn_affine(st1_ref[...], g1_ref[...], be1_ref[...], inv_count)
    h = y1_ref[...] * sc + sh
    a = alpha_ref[...]                                    # (1, 1) shared PReLU parameter
    h = jnp.where(h >= 0.0, h, a * h)
    y = _conv3x3_vpu(h, mask_ref[...], w_ref[...], b_ref[...], width=width)
    y2_ref[...] = y
    _write_stats(stats_ref, y)


def _stage3_kernel(y2_ref, x_ref, st2_ref, g2_ref, be2_ref, o_ref, *, inv_count):
    # BN2 affine + residual add on the lane-dense block (output aliased onto y2).
    sc, sh = _bn_affine(st2_ref[...], g2_ref[...], be2_ref[...], inv_count)
    o_ref[...] = y2_ref[...] * sc + sh + x_ref[...]


# --------------------------------------------------------------------------------------
# Wrapper
# --------------------------------------------------------------------------------------
def _make_masks(H, W, nb):
    ys, xs = np.meshgrid(np.arange(H), np.arange(W), indexing="ij")
    rows = []
    for dy in (-1, 0, 1):
        for dx in (-1, 0, 1):
            ok = (ys + dy >= 0) & (ys + dy < H) & (xs + dx >= 0) & (xs + dx < W)
            rows.append(ok.reshape(-1).astype(np.float32))
    m = np.stack(rows, axis=0)                  # (9, H*W)
    return np.tile(m, (1, nb))                  # (9, nb*H*W)


def residual_block(x_nchw, params, *, nb=None):
    """Pallas implementation of ResidualBlock.forward for NCHW input (train-mode BN)."""
    N, C, H, W = x_nchw.shape
    if nb is None:
        nb = 1 if N >= 2 else N                 # keep grid length >= 2 (v7x: 2 TensorCores)
    assert N % nb == 0
    G = N // nb                                 # grid length
    M = nb * H * W                              # lanes per block (dense, multiple of 128 here)
    total = N * H * W
    inv_count = 1.0 / float(total)

    # Channels-major, lane-dense activation layout: (C, N*H*W).
    xcf = jnp.transpose(x_nchw, (1, 0, 2, 3)).reshape(C, total).astype(jnp.float32)

    # PyTorch conv weight (Cout, Cin, 3, 3) -> (Cout, kH, kW, Cin) -> (Cout, 9*Cin).
    wT1 = jnp.transpose(params["w1"], (0, 2, 3, 1)).reshape(C, 9 * C).astype(jnp.float32)
    wT2 = jnp.transpose(params["w2"], (0, 2, 3, 1)).reshape(C, 9 * C).astype(jnp.float32)
    b1 = params["b1"].reshape(C, 1).astype(jnp.float32)
    b2 = params["b2"].reshape(C, 1).astype(jnp.float32)
    g1 = params["gamma1"].reshape(C, 1).astype(jnp.float32)
    be1 = params["beta1"].reshape(C, 1).astype(jnp.float32)
    g2 = params["gamma2"].reshape(C, 1).astype(jnp.float32)
    be2 = params["beta2"].reshape(C, 1).astype(jnp.float32)
    alpha = params["alpha"].reshape(1, 1).astype(jnp.float32)
    mask = jnp.asarray(_make_masks(H, W, nb))

    cp = pltpu.CompilerParams(dimension_semantics=("parallel",),
                              vmem_limit_bytes=32 * 1024 * 1024)

    act = pl.BlockSpec((C, M), lambda n: (0, n))            # lane-dense activation block
    stat_blk = pl.BlockSpec((1, C, 2), lambda n: (n, 0, 0))  # per-block stats (output)
    stat_all = pl.BlockSpec((G, C, 2), lambda n: (0, 0, 0))  # all stats (input, tiny)
    msk = pl.BlockSpec((9, M), lambda n: (0, 0))
    wsp = pl.BlockSpec((C, 9 * C), lambda n: (0, 0))
    cvec = pl.BlockSpec((C, 1), lambda n: (0, 0))
    one = pl.BlockSpec((1, 1), lambda n: (0, 0))

    # ---- Stage 1: conv1 (+ per-block BN1 partial stats) -------------------------------
    y1, st1 = pl.pallas_call(
        functools.partial(_stage1_kernel, width=W),
        grid=(G,),
        in_specs=[act, msk, wsp, cvec],
        out_specs=[act, stat_blk],
        out_shape=[jax.ShapeDtypeStruct((C, total), jnp.float32),
                   jax.ShapeDtypeStruct((G, C, 2), jnp.float32)],
        compiler_params=cp,
    )(xcf, mask, wT1, b1)

    # ---- Stage 2: BN1 (stats folded in-kernel) + PReLU + conv2 (+ BN2 partial stats) ---
    y2, st2 = pl.pallas_call(
        functools.partial(_stage2_kernel, width=W, inv_count=inv_count),
        grid=(G,),
        in_specs=[act, stat_all, cvec, cvec, one, msk, wsp, cvec],
        out_specs=[act, stat_blk],
        out_shape=[jax.ShapeDtypeStruct((C, total), jnp.float32),
                   jax.ShapeDtypeStruct((G, C, 2), jnp.float32)],
        compiler_params=cp,
    )(y1, st1, g1, be1, alpha, mask, wT2, b2)

    # ---- Stage 3: BN2 affine + residual add (output aliased onto y2) -------------------
    out = pl.pallas_call(
        functools.partial(_stage3_kernel, inv_count=inv_count),
        grid=(G,),
        in_specs=[act, act, stat_all, cvec, cvec],
        out_specs=act,
        out_shape=jax.ShapeDtypeStruct((C, total), jnp.float32),
        input_output_aliases={0: 0},
        compiler_params=cp,
    )(y2, xcf, st2, g2, be2)

    out = out.reshape(C, N, H, W)
    return jnp.transpose(out, (1, 0, 2, 3)).astype(x_nchw.dtype)


# --------------------------------------------------------------------------------------
# Pure-JAX reference (NCHW) of the PyTorch module in train mode
# --------------------------------------------------------------------------------------
def _reference(x, p):
    def conv(x, w, b):
        y = lax.conv_general_dilated(
            x, w, window_strides=(1, 1), padding="SAME",
            dimension_numbers=("NCHW", "OIHW", "NCHW"),
            precision=lax.Precision.HIGHEST)
        return y + b[None, :, None, None]

    def bn(x, g, be):
        mean = jnp.mean(x, axis=(0, 2, 3), keepdims=True)
        var = jnp.mean((x - mean) ** 2, axis=(0, 2, 3), keepdims=True)
        return (x - mean) / jnp.sqrt(var + EPS) * g[None, :, None, None] + be[None, :, None, None]

    out = bn(conv(x, p["w1"], p["b1"]), p["gamma1"], p["beta1"])
    out = jnp.where(out >= 0, out, p["alpha"][0] * out)
    out = bn(conv(out, p["w2"], p["b2"]), p["gamma2"], p["beta2"])
    return out + x


if __name__ == "__main__":
    N, C, H, W = 2, 4, 16, 16
    key = jax.random.PRNGKey(0)
    keys = jax.random.split(key, 10)
    bound = 1.0 / np.sqrt(C * 3 * 3)                  # PyTorch Conv2d default init bound
    params = {
        "w1": jax.random.uniform(keys[0], (C, C, 3, 3), jnp.float32, -bound, bound),
        "b1": jax.random.uniform(keys[1], (C,), jnp.float32, -bound, bound),
        "w2": jax.random.uniform(keys[2], (C, C, 3, 3), jnp.float32, -bound, bound),
        "b2": jax.random.uniform(keys[3], (C,), jnp.float32, -bound, bound),
        "gamma1": 1.0 + 0.1 * jax.random.normal(keys[4], (C,), jnp.float32),
        "beta1": 0.1 * jax.random.normal(keys[5], (C,), jnp.float32),
        "gamma2": 1.0 + 0.1 * jax.random.normal(keys[6], (C,), jnp.float32),
        "beta2": 0.1 * jax.random.normal(keys[7], (C,), jnp.float32),
        "alpha": jnp.array([0.25], jnp.float32),      # nn.PReLU() default shared parameter
    }
    x = jax.random.normal(keys[8], (N, C, H, W), jnp.float32)

    fn = jax.jit(residual_block)
    out = jax.block_until_ready(fn(x, params))
    ref = jax.block_until_ready(_reference(x, params))

    assert out.shape == x.shape and out.dtype == x.dtype
    # Conv is exact f32 on the VPU (no MXU bf16 passes), so the tolerance is tight now.
    np.testing.assert_allclose(np.asarray(out), np.asarray(ref), atol=1e-3, rtol=1e-3)
    print("KERNEL_OK")
</pallas_src>

<mosaic_0001>
module attributes {stable_mosaic.version = 11 : i64} {
  func.func @_stage3_kernel(%arg0: i32, %arg1: memref<4x256xf32, #tpu.memory_space<vmem>>, %arg2: memref<4x256xf32, #tpu.memory_space<vmem>>, %arg3: memref<2x4x2xf32, #tpu.memory_space<vmem>>, %arg4: memref<4x1xf32, #tpu.memory_space<vmem>>, %arg5: memref<4x1xf32, #tpu.memory_space<vmem>>, %arg6: memref<4x256xf32, #tpu.memory_space<vmem>>) attributes {dimension_semantics = [#tpu.dimension_semantics<parallel>], iteration_bounds = array<i64: 2>, scalar_prefetch = 0 : i64, scratch_operands = 0 : i64, tpu.core_type = #tpu.core_type<tc>, window_params = [{transform_indices = @transform_0, window_bounds = array<i64: 4, 256>}, {transform_indices = @transform_1, window_bounds = array<i64: 4, 256>}, {pipeline_mode = #tpu.pipeline_mode<synchronous>, transform_indices = @transform_2, window_bounds = array<i64: 2, 4, 2>}, {pipeline_mode = #tpu.pipeline_mode<synchronous>, transform_indices = @transform_3, window_bounds = array<i64: 4, 1>}, {pipeline_mode = #tpu.pipeline_mode<synchronous>, transform_indices = @transform_4, window_bounds = array<i64: 4, 1>}, {transform_indices = @transform_5, window_bounds = array<i64: 4, 256>}]} {
    %c0 = arith.constant 0 : index
    %c0_0 = arith.constant 0 : index
    %c0_1 = arith.constant 0 : index
    %0 = vector.load %arg3[%c0, %c0_0, %c0_1] : memref<2x4x2xf32, #tpu.memory_space<vmem>>, vector<2x4x2xf32>
    %c0_2 = arith.constant 0 : index
    %c0_3 = arith.constant 0 : index
    %1 = vector.load %arg4[%c0_2, %c0_3] : memref<4x1xf32, #tpu.memory_space<vmem>>, vector<4x1xf32>
    %c0_4 = arith.constant 0 : index
    %c0_5 = arith.constant 0 : index
    %2 = vector.load %arg5[%c0_4, %c0_5] : memref<4x1xf32, #tpu.memory_space<vmem>>, vector<4x1xf32>
    %cst = arith.constant dense<0.000000e+00> : vector<4x2xf32>
    %3 = vector.multi_reduction <add>, %0, %cst [0] : vector<2x4x2xf32> to vector<4x2xf32>
    %4 = vector.extract_strided_slice %3 {offsets = [0, 0], sizes = [4, 1], strides = [1, 1]} : vector<4x2xf32> to vector<4x1xf32>
    %cst_6 = arith.constant 0.001953125 : f32
    %5 = vector.broadcast %cst_6 : f32 to vector<4x1xf32>
    %6 = arith.mulf %4, %5 : vector<4x1xf32>
    %7 = vector.extract_strided_slice %3 {offsets = [0, 1], sizes = [4, 1], strides = [1, 1]} : vector<4x2xf32> to vector<4x1xf32>
    %cst_7 = arith.constant 0.001953125 : f32
    %8 = vector.broadcast %cst_7 : f32 to vector<4x1xf32>
    %9 = arith.mulf %7, %8 : vector<4x1xf32>
    %10 = arith.mulf %6, %6 : vector<4x1xf32>
    %11 = arith.subf %9, %10 : vector<4x1xf32>
    %cst_8 = arith.constant 9.99999974E-6 : f32
    %12 = vector.broadcast %cst_8 : f32 to vector<4x1xf32>
    %13 = arith.addf %11, %12 : vector<4x1xf32>
    %14 = math.rsqrt %13 : vector<4x1xf32>
    %15 = arith.mulf %1, %14 : vector<4x1xf32>
    %16 = arith.mulf %6, %15 : vector<4x1xf32>
    %17 = arith.subf %2, %16 : vector<4x1xf32>
    %c0_9 = arith.constant 0 : index
    %c0_10 = arith.constant 0 : index
    %18 = vector.load %arg1[%c0_9, %c0_10] : memref<4x256xf32, #tpu.memory_space<vmem>>, vector<4x256xf32>
    %19 = vector.broadcast %15 : vector<4x1xf32> to vector<4x256xf32>
    %20 = arith.mulf %18, %19 : vector<4x256xf32>
    %21 = vector.broadcast %17 : vector<4x1xf32> to vector<4x256xf32>
    %22 = arith.addf %20, %21 : vector<4x256xf32>
    %c0_11 = arith.constant 0 : index
    %c0_12 = arith.constant 0 : index
    %23 = vector.load %arg2[%c0_11, %c0_12] : memref<4x256xf32, #tpu.memory_space<vmem>>, vector<4x256xf32>
    %24 = arith.addf %22, %23 : vector<4x256xf32>
    %c0_13 = arith.constant 0 : index
    %c0_14 = arith.constant 0 : index
    %25 = vector.load %arg6[%c0_13, %c0_14] : memref<4x256xf32, #tpu.memory_space<vmem>>, vector<4x256xf32>
    tpu.vector_store %arg6[%c0_13, %c0_14], %24 {strides = array<i32>} : memref<4x256xf32, #tpu.memory_space<vmem>>, vector<4x256xf32>,
    return
  }
  func.func @transform_0(%arg0: i32) -> (i32, i32) {
    %c0_i32 = arith.constant 0 : i32
    %c0_i32_0 = arith.constant 0 : i32
    return %c0_i32, %arg0 : i32, i32
  }
  func.func @transform_1(%arg0: i32) -> (i32, i32) {
    %c0_i32 = arith.constant 0 : i32
    %c0_i32_0 = arith.constant 0 : i32
    return %c0_i32, %arg0 : i32, i32
  }
  func.func @transform_2(%arg0: i32) -> (i32, i32, i32) {
    %c0_i32 = arith.constant 0 : i32
    %c0_i32_0 = arith.constant 0 : i32
    %c0_i32_1 = arith.constant 0 : i32
    %c0_i32_2 = arith.constant 0 : i32
    return %c0_i32, %c0_i32_0, %c0_i32_1 : i32, i32, i32
  }
  func.func @transform_3(%arg0: i32) -> (i32, i32) {
    %c0_i32 = arith.constant 0 : i32
    %c0_i32_0 = arith.constant 0 : i32
    %c0_i32_1 = arith.constant 0 : i32
    return %c0_i32, %c0_i32_0 : i32, i32
  }
  func.func @transform_4(%arg0: i32) -> (i32, i32) {
    %c0_i32 = arith.constant 0 : i32
    %c0_i32_0 = arith.constant 0 : i32
    %c0_i32_1 = arith.constant 0 : i32
    return %c0_i32, %c0_i32_0 : i32, i32
  }
  func.func @transform_5(%arg0: i32) -> (i32, i32) {
    %c0_i32 = arith.constant 0 : i32
    %c0_i32_0 = arith.constant 0 : i32
    return %c0_i32, %arg0 : i32, i32
  }
}

module attributes {stable_mosaic.version = 11 : i64} {
  func.func @_stage1_kernel(%arg0: i32, %arg1: memref<4x256xf32, #tpu.memory_space<vmem>>, %arg2: memref<9x256xf32, #tpu.memory_space<vmem>>, %arg3: memref<4x36xf32, #tpu.memory_space<vmem>>, %arg4: memref<4x1xf32, #tpu.memory_space<vmem>>, %arg5: memref<4x256xf32, #tpu.memory_space<vmem>>, %arg6: memref<1x4x2xf32, #tpu.memory_space<vmem>>) attributes {dimension_semantics = [#tpu.dimension_semantics<parallel>], iteration_bounds = array<i64: 2>, scalar_prefetch = 0 : i64, scratch_operands = 0 : i64, tpu.core_type = #tpu.core_type<tc>, window_params = [{transform_indices = @transform_0, window_bounds = array<i64: 4, 256>}, {pipeline_mode = #tpu.pipeline_mode<synchronous>, transform_indices = @transform_1, window_bounds = array<i64: 9, 256>}, {pipeline_mode = #tpu.pipeline_mode<synchronous>, transform_indices = @transform_2, window_bounds = array<i64: 4, 36>}, {pipeline_mode = #tpu.pipeline_mode<synchronous>, transform_indices = @transform_3, window_bounds = array<i64: 4, 1>}, {transform_indices = @transform_4, window_bounds = array<i64: 4, 256>}, {transform_indices = @transform_5, window_bounds = array<i64: 1, 4, 2>}]} {
    %c0 = arith.constant 0 : index
    %c0_0 = arith.constant 0 : index
    %0 = vector.load %arg1[%c0, %c0_0] : memref<4x256xf32, #tpu.memory_space<vmem>>, vector<4x256xf32>
    %c0_1 = arith.constant 0 : index
    %c0_2 = arith.constant 0 : index
    %1 = vector.load %arg2[%c0_1, %c0_2] : memref<9x256xf32, #tpu.memory_space<vmem>>, vector<9x256xf32>
    %c0_3 = arith.constant 0 : index
    %c0_4 = arith.constant 0 : index
    %2 = vector.load %arg3[%c0_3, %c0_4] : memref<4x36xf32, #tpu.memory_space<vmem>>, vector<4x36xf32>
    %c0_5 = arith.constant 0 : index
    %c0_6 = arith.constant 0 : index
    %3 = vector.load %arg4[%c0_5, %c0_6] : memref<4x1xf32, #tpu.memory_space<vmem>>, vector<4x1xf32>
    %cst = arith.constant 0.000000e+00 : f32
    %4 = vector.broadcast %cst : f32 to vector<4x256xf32>
    %c17_i32 = arith.constant 17 : i32
    %5 = tpu.dynamic_rotate %0 by %c17_i32 dim 1 : vector<4x256xf32>, i32 -> vector<4x256xf32>
    %6 = vector.extract_strided_slice %1 {offsets = [0, 0], sizes = [1, 256], strides = [1, 1]} : vector<9x256xf32> to vector<1x256xf32>
    %7 = vector.broadcast %6 : vector<1x256xf32> to vector<4x256xf32>
    %8 = arith.mulf %5, %7 : vector<4x256xf32>
    %9 = vector.extract_strided_slice %2 {offsets = [0, 0], sizes = [4, 1], strides = [1, 1]} : vector<4x36xf32> to vector<4x1xf32>
    %10 = vector.extract_strided_slice %8 {offsets = [0, 0], sizes = [1, 256], strides = [1, 1]} : vector<4x256xf32> to vector<1x256xf32>
    %11 = vector.broadcast %9 : vector<4x1xf32> to vector<4x256xf32>
    %12 = vector.broadcast %10 : vector<1x256xf32> to vector<4x256xf32>
    %13 = arith.mulf %11, %12 : vector<4x256xf32>
    %14 = arith.addf %4, %13 : vector<4x256xf32>
    %15 = vector.extract_strided_slice %2 {offsets = [0, 1], sizes = [4, 1], strides = [1, 1]} : vector<4x36xf32> to vector<4x1xf32>
    %16 = vector.extract_strided_slice %8 {offsets = [1, 0], sizes = [1, 256], strides = [1, 1]} : vector<4x256xf32> to vector<1x256xf32>
    %17 = vector.broadcast %15 : vector<4x1xf32> to vector<4x256xf32>
    %18 = vector.broadcast %16 : vector<1x256xf32> to vector<4x256xf32>
    %19 = arith.mulf %17, %18 : vector<4x256xf32>
    %20 = arith.addf %14, %19 : vector<4x256xf32>
    %21 = vector.extract_strided_slice %2 {offsets = [0, 2], sizes = [4, 1], strides = [1, 1]} : vector<4x36xf32> to vector<4x1xf32>
    %22 = vector.extract_strided_slice %8 {offsets = [2, 0], sizes = [1, 256], strides = [1, 1]} : vector<4x256xf32> to vector<1x256xf32>
    %23 = vector.broadcast %21 : vector<4x1xf32> to vector<4x256xf32>
    %24 = vector.broadcast %22 : vector<1x256xf32> to vector<4x256xf32>
    %25 = arith.mulf %23, %24 : vector<4x256xf32>
    %26 = arith.addf %20, %25 : vector<4x256xf32>
    %27 = vector.extract_strided_slice %2 {offsets = [0, 3], sizes = [4, 1], strides = [1, 1]} : vector<4x36xf32> to vector<4x1xf32>
    %28 = vector.extract_strided_slice %8 {offsets = [3, 0], sizes = [1, 256], strides = [1, 1]} : vector<4x256xf32> to vector<1x256xf32>
    %29 = vector.broadcast %27 : vector<4x1xf32> to vector<4x256xf32>
    %30 = vector.broadcast %28 : vector<1x256xf32> to vector<4x256xf32>
    %31 = arith.mulf %29, %30 : vector<4x256xf32>
    %32 = arith.addf %26, %31 : vector<4x256xf32>
    %c16_i32 = arith.constant 16 : i32
    %33 = tpu.dynamic_rotate %0 by %c16_i32 dim 1 : vector<4x256xf32>, i32 -> vector<4x256xf32>
    %34 = vector.extract_strided_slice %1 {offsets = [1, 0], sizes = [1, 256], strides = [1, 1]} : vector<9x256xf32> to vector<1x256xf32>
    %35 = vector.broadcast %34 : vector<1x256xf32> to vector<4x256xf32>
    %36 = arith.mulf %33, %35 : vector<4x256xf32>
    %37 = vector.extract_strided_slice %2 {offsets = [0, 4], sizes = [4, 1], strides = [1, 1]} : vector<4x36xf32> to vector<4x1xf32>
    %38 = vector.extract_strided_slice %36 {offsets = [0, 0], sizes = [1, 256], strides = [1, 1]} : vector<4x256xf32> to vector<1x256xf32>
    %39 = vector.broadcast %37 : vector<4x1xf32> to vector<4x256xf32>
    %40 = vector.broadcast %38 : vector<1x256xf32> to vector<4x256xf32>
    %41 = arith.mulf %39, %40 : vector<4x256xf32>
    %42 = arith.addf %32, %41 : vector<4x256xf32>
    %43 = vector.extract_strided_slice %2 {offsets = [0, 5], sizes = [4, 1], strides = [1, 1]} : vector<4x36xf32> to vector<4x1xf32>
    %44 = vector.extract_strided_slice %36 {offsets = [1, 0], sizes = [1, 256], strides = [1, 1]} : vector<4x256xf32> to vector<1x256xf32>
    %45 = vector.broadcast %43 : vector<4x1xf32> to vector<4x256xf32>
    %46 = vector.broadcast %44 : vector<1x256xf32> to vector<4x256xf32>
    %47 = arith.mulf %45, %46 : vector<4x256xf32>
    %48 = arith.addf %42, %47 : vector<4x256xf32>
    %49 = vector.extract_strided_slice %2 {offsets = [0, 6], sizes = [4, 1], strides = [1, 1]} : vector<4x36xf32> to vector<4x1xf32>
    %50 = vector.extract_strided_slice %36 {offsets = [2, 0], sizes = [1, 256], strides = [1, 1]} : vector<4x256xf32> to vector<1x256xf32>
    %51 = vector.broadcast %49 : vector<4x1xf32> to vector<4x256xf32>
    %52 = vector.broadcast %50 : vector<1x256xf32> to vector<4x256xf32>
    %53 = arith.mulf %51, %52 : vector<4x256xf32>
    %54 = arith.addf %48, %53 : vector<4x256xf32>
    %55 = vector.extract_strided_slice %2 {offsets = [0, 7], sizes = [4, 1], strides = [1, 1]} : vector<4x36xf32> to vector<4x1xf32>
    %56 = vector.extract_strided_slice %36 {offsets = [3, 0], sizes = [1, 256], strides = [1, 1]} : vector<4x256xf32> to vector<1x256xf32>
    %57 = vector.broadcast %55 : vector<4x1xf32> to vector<4x256xf32>
    %58 = vector.broadcast %56 : vector<1x256xf32> to vector<4x256xf32>
    %59 = arith.mulf %57, %58 : vector<4x256xf32>
    %60 = arith.addf %54, %59 : vector<4x256xf32>
    %c15_i32 = arith.constant 15 : i32
    %61 = tpu.dynamic_rotate %0 by %c15_i32 dim 1 : vector<4x256xf32>, i32 -> vector<4x256xf32>
    %62 = vector.extract_strided_slice %1 {offsets = [2, 0], sizes = [1, 256], strides = [1, 1]} : vector<9x256xf32> to vector<1x256xf32>
    %63 = vector.broadcast %62 : vector<1x256xf32> to vector<4x256xf32>
    %64 = arith.mulf %61, %63 : vector<4x256xf32>
    %65 = vector.extract_strided_slice %2 {offsets = [0, 8], sizes = [4, 1], strides = [1, 1]} : vector<4x36xf32> to vector<4x1xf32>
    %66 = vector.extract_strided_slice %64 {offsets = [0, 0], sizes = [1, 256], strides = [1, 1]} : vector<4x256xf32> to vector<1x256xf32>
    %67 = vector.broadcast %65 : vector<4x1xf32> to vector<4x256xf32>
    %68 = vector.broadcast %66 : vector<1x256xf32> to vector<4x256xf32>
    %69 = arith.mulf %67, %68 : vector<4x256xf32>
    %70 = arith.addf %60, %69 : vector<4x256xf32>
    %71 = vector.extract_strided_slice %2 {offsets = [0, 9], sizes = [4, 1], strides = [1, 1]} : vector<4x36xf32> to vector<4x1xf32>
    %72 = vector.extract_strided_slice %64 {offsets = [1, 0], sizes = [1, 256], strides = [1, 1]} : vector<4x256xf32> to vector<1x256xf32>
    %73 = vector.broadcast %71 : vector<4x1xf32> to vector<4x256xf32>
    %74 = vector.broadcast %72 : vector<1x256xf32> to vector<4x256xf32>
    %75 = arith.mulf %73, %74 : vector<4x256xf32>
    %76 = arith.addf %70, %75 : vector<4x256xf32>
    %77 = vector.extract_strided_slice %2 {offsets = [0, 10], sizes = [4, 1], strides = [1, 1]} : vector<4x36xf32> to vector<4x1xf32>
    %78 = vector.extract_strided_slice %64 {offsets = [2, 0], sizes = [1, 256], strides = [1, 1]} : vector<4x256xf32> to vector<1x256xf32>
    %79 = vector.broadcast %77 : vector<4x1xf32> to vector<4x256xf32>
    %80 = vector.broadcast %78 : vector<1x256xf32> to vector<4x256xf32>
    %81 = arith.mulf %79, %80 : vector<4x256xf32>
    %82 = arith.addf %76, %81 : vector<4x256xf32>
    %83 = vector.extract_strided_slice %2 {offsets = [0, 11], sizes = [4, 1], strides = [1, 1]} : vector<4x36xf32> to vector<4x1xf32>
    %84 = vector.extract_strided_slice %64 {offsets = [3, 0], sizes = [1, 256], strides = [1, 1]} : vector<4x256xf32> to vector<1x256xf32>
    %85 = vector.broadcast %83 : vector<4x1xf32> to vector<4x256xf32>
    %86 = vector.broadcast %84 : vector<1x256xf32> to vector<4x256xf32>
    %87 = arith.mulf %85, %86 : vector<4x256xf32>
    %88 = arith.addf %82, %87 : vector<4x256xf32>
    %c1_i32 = arith.constant 1 : i32
    %89 = tpu.dynamic_rotate %0 by %c1_i32 dim 1 : vector<4x256xf32>, i32 -> vector<4x256xf32>
    %90 = vector.extract_strided_slice %1 {offsets = [3, 0], sizes = [1, 256], strides = [1, 1]} : vector<9x256xf32> to vector<1x256xf32>
    %91 = vector.broadcast %90 : vector<1x256xf32> to vector<4x256xf32>
    %92 = arith.mulf %89, %91 : vector<4x256xf32>
    %93 = vector.extract_strided_slice %2 {offsets = [0, 12], sizes = [4, 1], strides = [1, 1]} : vector<4x36xf32> to vector<4x1xf32>
    %94 = vector.extract_strided_slice %92 {offsets = [0, 0], sizes = [1, 256], strides = [1, 1]} : vector<4x256xf32> to vector<1x256xf32>
    %95 = vector.broadcast %93 : vector<4x1xf32> to vector<4x256xf32>
    %96 = vector.broadcast %94 : vector<1x256xf32> to vector<4x256xf32>
    %97 = arith.mulf %95, %96 : vector<4x256xf32>
    %98 = arith.addf %88, %97 : vector<4x256xf32>
    %99 = vector.extract_strided_slice %2 {offsets = [0, 13], sizes = [4, 1], strides = [1, 1]} : vector<4x36xf32> to vector<4x1xf32>
    %100 = vector.extract_strided_slice %92 {offsets = [1, 0], sizes = [1, 256], strides = [1, 1]} : vector<4x256xf32> to vector<1x256xf32>
    %101 = vector.broadcast %99 : vector<4x1xf32> to vector<4x256xf32>
    %102 = vector.broadcast %100 : vector<1x256xf32> to vector<4x256xf32>
    %103 = arith.mulf %101, %102 : vector<4x256xf32>
    %104 = arith.addf %98, %103 : vector<4x256xf32>
    %105 = vector.extract_strided_slice %2 {offsets = [0, 14], sizes = [4, 1], strides = [1, 1]} : vector<4x36xf32> to vector<4x1xf32>
    %106 = vector.extract_strided_slice %92 {offsets = [2, 0], sizes = [1, 256], strides = [1, 1]} : vector<4x256xf32> to vector<1x256xf32>
    %107 = vector.broadcast %105 : vector<4x1xf32> to vector<4x256xf32>
    %108 = vector.broadcast %106 : vector<1x256xf32> to vector<4x256xf32>
    %109 = arith.mulf %107, %108 : vector<4x256xf32>
    %110 = arith.addf %104, %109 : vector<4x256xf32>
    %111 = vector.extract_strided_slice %2 {offsets = [0, 15], sizes = [4, 1], strides = [1, 1]} : vector<4x36xf32> to vector<4x1xf32>
    %112 = vector.extract_strided_slice %92 {offsets = [3, 0], sizes = [1, 256], strides = [1, 1]} : vector<4x256xf32> to vector<1x256xf32>
    %113 = vector.broadcast %111 : vector<4x1xf32> to vector<4x256xf32>
    %114 = vector.broadcast %112 : vector<1x256xf32> to vector<4x256xf32>
    %115 = arith.mulf %113, %114 : vector<4x256xf32>
    %116 = arith.addf %110, %115 : vector<4x256xf32>
    %117 = vector.extract_strided_slice %2 {offsets = [0, 16], sizes = [4, 1], strides = [1, 1]} : vector<4x36xf32> to vector<4x1xf32>
    %118 = vector.extract_strided_slice %0 {offsets = [0, 0], sizes = [1, 256], strides = [1, 1]} : vector<4x256xf32> to vector<1x256xf32>
    %119 = vector.broadcast %117 : vector<4x1xf32> to vector<4x256xf32>
    %120 = vector.broadcast %118 : vector<1x256xf32> to vector<4x256xf32>
    %121 = arith.mulf %119, %120 : vector<4x256xf32>
    %122 = arith.addf %116, %121 : vector<4x256xf32>
    %123 = vector.extract_strided_slice %2 {offsets = [0, 17], sizes = [4, 1], strides = [1, 1]} : vector<4x36xf32> to vector<4x1xf32>
    %124 = vector.extract_strided_slice %0 {offsets = [1, 0], sizes = [1, 256], strides = [1, 1]} : vector<4x256xf32> to vector<1x256xf32>
    %125 = vector.broadcast %123 : vector<4x1xf32> to vector<4x256xf32>
    %126 = vector.broadcast %124 : vector<1x256xf32> to vector<4x256xf32>
    %127 = arith.mulf %125, %126 : vector<4x256xf32>
    %128 = arith.addf %122, %127 : vector<4x256xf32>
    %129 = vector.extract_strided_slice %2 {offsets = [0, 18], sizes = [4, 1], strides = [1, 1]} : vector<4x36xf32> to vector<4x1xf32>
    %130 = vector.extract_strided_slice %0 {offsets = [2, 0], sizes = [1, 256], strides = [1, 1]} : vector<4x256xf32> to vector<1x256xf32>
    %131 = vector.broadcast %129 : vector<4x1xf32> to vector<4x256xf32>
    %132 = vector.broadcast %130 : vector<1x256xf32> to vector<4x256xf32>
    %133 = arith.mulf %131, %132 : vector<4x256xf32>
    %134 = arith.addf %128, %133 : vector<4x256xf32>
    %135 = vector.extract_strided_slice %2 {offsets = [0, 19], sizes = [4, 1], strides = [1, 1]} : vector<4x36xf32> to vector<4x1xf32>
    %136 = vector.extract_strided_slice %0 {offsets = [3, 0], sizes = [1, 256], strides = [1, 1]} : vector<4x256xf32> to vector<1x256xf32>
    %137 = vector.broadcast %135 : vector<4x1xf32> to vector<4x256xf32>
    %138 = vector.broadcast %136 : vector<1x256xf32> to vector<4x256xf32>
    %139 = arith.mulf %137, %138 : vector<4x256xf32>
    %140 = arith.addf %134, %139 : vector<4x256xf32>
    %c255_i32 = arith.constant 255 : i32
    %141 = tpu.dynamic_rotate %0 by %c255_i32 dim 1 : vector<4x256xf32>, i32 -> vector<4x256xf32>
    %142 = vector.extract_strided_slice %1 {offsets = [5, 0], sizes = [1, 256], strides = [1, 1]} : vector<9x256xf32> to vector<1x256xf32>
    %143 = vector.broadcast %142 : vector<1x256xf32> to vector<4x256xf32>
    %144 = arith.mulf %141, %143 : vector<4x256xf32>
    %145 = vector.extract_strided_slice %2 {offsets = [0, 20], sizes = [4, 1], strides = [1, 1]} : vector<4x36xf32> to vector<4x1xf32>
    %146 = vector.extract_strided_slice %144 {offsets = [0, 0], sizes = [1, 256], strides = [1, 1]} : vector<4x256xf32> to vector<1x256xf32>
    %147 = vector.broadcast %145 : vector<4x1xf32> to vector<4x256xf32>
    %148 = vector.broadcast %146 : vector<1x256xf32> to vector<4x256xf32>
    %149 = arith.mulf %147, %148 : vector<4x256xf32>
    %150 = arith.addf %140, %149 : vector<4x256xf32>
    %151 = vector.extract_strided_slice %2 {offsets = [0, 21], sizes = [4, 1], strides = [1, 1]} : vector<4x36xf32> to vector<4x1xf32>
    %152 = vector.extract_strided_slice %144 {offsets = [1, 0], sizes = [1, 256], strides = [1, 1]} : vector<4x256xf32> to vector<1x256xf32>
    %153 = vector.broadcast %151 : vector<4x1xf32> to vector<4x256xf32>
    %154 = vector.broadcast %152 : vector<1x256xf32> to vector<4x256xf32>
    %155 = arith.mulf %153, %154 : vector<4x256xf32>
    %156 = arith.addf %150, %155 : vector<4x256xf32>
    %157 = vector.extract_strided_slice %2 {offsets = [0, 22], sizes = [4, 1], strides = [1, 1]} : vector<4x36xf32> to vector<4x1xf32>
    %158 = vector.extract_strided_slice %144 {offsets = [2, 0], sizes = [1, 256], strides = [1, 1]} : vector<4x256xf32> to vector<1x256xf32>
    %159 = vector.broadcast %157 : vector<4x1xf32> to vector<4x256xf32>
    %160 = vector.broadcast %158 : vector<1x256xf32> to vector<4x256xf32>
    %161 = arith.mulf %159, %160 : vector<4x256xf32>
    %162 = arith.addf %156, %161 : vector<4x256xf32>
    %163 = vector.extract_strided_slice %2 {offsets = [0, 23], sizes = [4, 1], strides = [1, 1]} : vector<4x36xf32> to vector<4x1xf32>
    %164 = vector.extract_strided_slice %144 {offsets = [3, 0], sizes = [1, 256], strides = [1, 1]} : vector<4x256xf32> to vector<1x256xf32>
    %165 = vector.broadcast %163 : vector<4x1xf32> to vector<4x256xf32>
    %166 = vector.broadcast %164 : vector<1x256xf32> to vector<4x256xf32>
    %167 = arith.mulf %165, %166 : vector<4x256xf32>
    %168 = arith.addf %162, %167 : vector<4x256xf32>
    %c241_i32 = arith.constant 241 : i32
    %169 = tpu.dynamic_rotate %0 by %c241_i32 dim 1 : vector<4x256xf32>, i32 -> vector<4x256xf32>
    %170 = vector.extract_strided_slice %1 {offsets = [6, 0], sizes = [1, 256], strides = [1, 1]} : vector<9x256xf32> to vector<1x256xf32>
    %171 = vector.broadcast %170 : vector<1x256xf32> to vector<4x256xf32>
    %172 = arith.mulf %169, %171 : vector<4x256xf32>
    %173 = vector.extract_strided_slice %2 {offsets = [0, 24], sizes = [4, 1], strides = [1, 1]} : vector<4x36xf32> to vector<4x1xf32>
    %174 = vector.extract_strided_slice %172 {offsets = [0, 0], sizes = [1, 256], strides = [1, 1]} : vector<4x256xf32> to vector<1x256xf32>
    %175 = vector.broadcast %173 : vector<4x1xf32> to vector<4x256xf32>
    %176 = vector.broadcast %174 : vector<1x256xf32> to vector<4x256xf32>
    %177 = arith.mulf %175, %176 : vector<4x256xf32>
    %178 = arith.addf %168, %177 : vector<4x256xf32>
    %179 = vector.extract_strided_slice %2 {offsets = [0, 25], sizes = [4, 1], strides = [1, 1]} : vector<4x36xf32> to vector<4x1xf32>
    %180 = vector.extract_strided_slice %172 {offsets = [1, 0], sizes = [1, 256], strides = [1, 1]} : vector<4x256xf32> to vector<1x256xf32>
    %181 = vector.broadcast %179 : vector<4x1xf32> to vector<4x256xf32>
    %182 = vector.broadcast %180 : vector<1x256xf32> to vector<4x256xf32>
    %183 = arith.mulf %181, %182 : vector<4x256xf32>
    %184 = arith.addf %178, %183 : vector<4x256xf32>
    %185 = vector.extract_strided_slice %2 {offsets = [0, 26], sizes = [4, 1], strides = [1, 1]} : vector<4x36xf32> to vector<4x1xf32>
    %186 = vector.extract_strided_slice %172 {offsets = [2, 0], sizes = [1, 256], strides = [1, 1]} : vector<4x256xf32> to vector<1x256xf32>
    %187 = vector.broadcast %185 : vector<4x1xf32> to vector<4x256xf32>
    %188 = vector.broadcast %186 : vector<1x256xf32> to vector<4x256xf32>
    %189 = arith.mulf %187, %188 : vector<4x256xf32>
    %190 = arith.addf %184, %189 : vector<4x256xf32>
    %191 = vector.extract_strided_slice %2 {offsets = [0, 27], sizes = [4, 1], strides = [1, 1]} : vector<4x36xf32> to vector<4x1xf32>
    %192 = vector.extract_strided_slice %172 {offsets = [3, 0], sizes = [1, 256], strides = [1, 1]} : vector<4x256xf32> to vector<1x256xf32>
    %193 = vector.broadcast %191 : vector<4x1xf32> to vector<4x256xf32>
    %194 = vector.broadcast %192 : vector<1x256xf32> to vector<4x256xf32>
    %195 = arith.mulf %193, %194 : vector<4x256xf32>
    %196 = arith.addf %190, %195 : vector<4x256xf32>
    %c240_i32 = arith.constant 240 : i32
    %197 = tpu.dynamic_rotate %0 by %c240_i32 dim 1 : vector<4x256xf32>, i32 -> vector<4x256xf32>
    %198 = vector.extract_strided_slice %1 {offsets = [7, 0], sizes = [1, 256], strides = [1, 1]} : vector<9x256xf32> to vector<1x256xf32>
    %199 = vector.broadcast %198 : vector<1x256xf32> to vector<4x256xf32>
    %200 = arith.mulf %197, %199 : vector<4x256xf32>
    %201 = vector.extract_strided_slice %2 {offsets = [0, 28], sizes = [4, 1], strides = [1, 1]} : vector<4x36xf32> to vector<4x1xf32>
    %202 = vector.extract_strided_slice %200 {offsets = [0, 0], sizes = [1, 256], strides = [1, 1]} : vector<4x256xf32> to vector<1x256xf32>
    %203 = vector.broadcast %201 : vector<4x1xf32> to vector<4x256xf32>
    %204 = vector.broadcast %202 : vector<1x256xf32> to vector<4x256xf32>
    %205 = arith.mulf %203, %204 : vector<4x256xf32>
    %206 = arith.addf %196, %205 : vector<4x256xf32>
    %207 = vector.extract_strided_slice %2 {offsets = [0, 29], sizes = [4, 1], strides = [1, 1]} : vector<4x36xf32> to vector<4x1xf32>
    %208 = vector.extract_strided_slice %200 {offsets = [1, 0], sizes = [1, 256], strides = [1, 1]} : vector<4x256xf32> to vector<1x256xf32>
    %209 = vector.broadcast %207 : vector<4x1xf32> to vector<4x256xf32>
    %210 = vector.broadcast %208 : vector<1x256xf32> to vector<4x256xf32>
    %211 = arith.mulf %209, %210 : vector<4x256xf32>
    %212 = arith.addf %206, %211 : vector<4x256xf32>
    %213 = vector.extract_strided_slice %2 {offsets = [0, 30], sizes = [4, 1], strides = [1, 1]} : vector<4x36xf32> to vector<4x1xf32>
    %214 = vector.extract_strided_slice %200 {offsets = [2, 0], sizes = [1, 256], strides = [1, 1]} : vector<4x256xf32> to vector<1x256xf32>
    %215 = vector.broadcast %213 : vector<4x1xf32> to vector<4x256xf32>
    %216 = vector.broadcast %214 : vector<1x256xf32> to vector<4x256xf32>
    %217 = arith.mulf %215, %216 : vector<4x256xf32>
    %218 = arith.addf %212, %217 : vector<4x256xf32>
    %219 = vector.extract_strided_slice %2 {offsets = [0, 31], sizes = [4, 1], strides = [1, 1]} : vector<4x36xf32> to vector<4x1xf32>
    %220 = vector.extract_strided_slice %200 {offsets = [3, 0], sizes = [1, 256], strides = [1, 1]} : vector<4x256xf32> to vector<1x256xf32>
    %221 = vector.broadcast %219 : vector<4x1xf32> to vector<4x256xf32>
    %222 = vector.broadcast %220 : vector<1x256xf32> to vector<4x256xf32>
    %223 = arith.mulf %221, %222 : vector<4x256xf32>
    %224 = arith.addf %218, %223 : vector<4x256xf32>
    %c239_i32 = arith.constant 239 : i32
    %225 = tpu.dynamic_rotate %0 by %c239_i32 dim 1 : vector<4x256xf32>, i32 -> vector<4x256xf32>
    %226 = vector.extract_strided_slice %1 {offsets = [8, 0], sizes = [1, 256], strides = [1, 1]} : vector<9x256xf32> to vector<1x256xf32>
    %227 = vector.broadcast %226 : vector<1x256xf32> to vector<4x256xf32>
    %228 = arith.mulf %225, %227 : vector<4x256xf32>
    %229 = vector.extract_strided_slice %2 {offsets = [0, 32], sizes = [4, 1], strides = [1, 1]} : vector<4x36xf32> to vector<4x1xf32>
    %230 = vector.extract_strided_slice %228 {offsets = [0, 0], sizes = [1, 256], strides = [1, 1]} : vector<4x256xf32> to vector<1x256xf32>
    %231 = vector.broadcast %229 : vector<4x1xf32> to vector<4x256xf32>
    %232 = vector.broadcast %230 : vector<1x256xf32> to vector<4x256xf32>
    %233 = arith.mulf %231, %232 : vector<4x256xf32>
    %234 = arith.addf %224, %233 : vector<4x256xf32>
    %235 = vector.extract_strided_slice %2 {offsets = [0, 33], sizes = [4, 1], strides = [1, 1]} : vector<4x36xf32> to vector<4x1xf32>
    %236 = vector.extract_strided_slice %228 {offsets = [1, 0], sizes = [1, 256], strides = [1, 1]} : vector<4x256xf32> to vector<1x256xf32>
    %237 = vector.broadcast %235 : vector<4x1xf32> to vector<4x256xf32>
    %238 = vector.broadcast %236 : vector<1x256xf32> to vector<4x256xf32>
    %239 = arith.mulf %237, %238 : vector<4x256xf32>
    %240 = arith.addf %234, %239 : vector<4x256xf32>
    %241 = vector.extract_strided_slice %2 {offsets = [0, 34], sizes = [4, 1], strides = [1, 1]} : vector<4x36xf32> to vector<4x1xf32>
    %242 = vector.extract_strided_slice %228 {offsets = [2, 0], sizes = [1, 256], strides = [1, 1]} : vector<4x256xf32> to vector<1x256xf32>
    %243 = vector.broadcast %241 : vector<4x1xf32> to vector<4x256xf32>
    %244 = vector.broadcast %242 : vector<1x256xf32> to vector<4x256xf32>
    %245 = arith.mulf %243, %244 : vector<4x256xf32>
    %246 = arith.addf %240, %245 : vector<4x256xf32>
    %247 = vector.extract_strided_slice %2 {offsets = [0, 35], sizes = [4, 1], strides = [1, 1]} : vector<4x36xf32> to vector<4x1xf32>
    %248 = vector.extract_strided_slice %228 {offsets = [3, 0], sizes = [1, 256], strides = [1, 1]} : vector<4x256xf32> to vector<1x256xf32>
    %249 = vector.broadcast %247 : vector<4x1xf32> to vector<4x256xf32>
    %250 = vector.broadcast %248 : vector<1x256xf32> to vector<4x256xf32>
    %251 = arith.mulf %249, %250 : vector<4x256xf32>
    %252 = arith.addf %246, %251 : vector<4x256xf32>
    %253 = vector.broadcast %3 : vector<4x1xf32> to vector<4x256xf32>
    %254 = arith.addf %252, %253 : vector<4x256xf32>
    %c0_7 = arith.constant 0 : index
    %c0_8 = arith.constant 0 : index
    %255 = vector.load %arg5[%c0_7, %c0_8] : memref<4x256xf32, #tpu.memory_space<vmem>>, vector<4x256xf32>
    tpu.vector_store %arg5[%c0_7, %c0_8], %254 {strides = array<i32>} : memref<4x256xf32, #tpu.memory_space<vmem>>, vector<4x256xf32>,
    %cst_9 = arith.constant dense<0.000000e+00> : vector<4xf32>
    %256 = vector.multi_reduction <add>, %254, %cst_9 [1] : vector<4x256xf32> to vector<4xf32>
    %257 = vector.shape_cast %256 : vector<4xf32> to vector<4x1xf32>
    %c0_10 = arith.constant 0 : index
    %c0_11 = arith.constant 0 : index
    %c0_12 = arith.constant 0 : index
    %258 = vector.load %arg6[%c0_10, %c0_11, %c0_12] : memref<1x4x2xf32, #tpu.memory_space<vmem>>, vector<1x4x1xf32>
    %259 = vector.shape_cast %258 : vector<1x4x1xf32> to vector<4x1xf32>
    %260 = vector.shape_cast %257 : vector<4x1xf32> to vector<1x4x1xf32>
    tpu.vector_store %arg6[%c0_10, %c0_11, %c0_12], %260 {strides = array<i32>} : memref<1x4x2xf32, #tpu.memory_space<vmem>>, vector<1x4x1xf32>,
    %261 = arith.mulf %254, %254 : vector<4x256xf32>
    %cst_13 = arith.constant dense<0.000000e+00> : vector<4xf32>
    %262 = vector.multi_reduction <add>, %261, %cst_13 [1] : vector<4x256xf32> to vector<4xf32>
    %263 = vector.shape_cast %262 : vector<4xf32> to vector<4x1xf32>
    %c0_14 = arith.constant 0 : index
    %c0_15 = arith.constant 0 : index
    %c1 = arith.constant 1 : index
    %264 = vector.load %arg6[%c0_14, %c0_15, %c1] : memref<1x4x2xf32, #tpu.memory_space<vmem>>, vector<1x4x1xf32>
    %265 = vector.shape_cast %264 : vector<1x4x1xf32> to vector<4x1xf32>
    %266 = vector.shape_cast %263 : vector<4x1xf32> to vector<1x4x1xf32>
    tpu.vector_store %arg6[%c0_14, %c0_15, %c1], %266 {strides = array<i32>} : memref<1x4x2xf32, #tpu.memory_space<vmem>>, vector<1x4x1xf32>,
    return
  }
  func.func @transform_0(%arg0: i32) -> (i32, i32) {
    %c0_i32 = arith.constant 0 : i32
    %c0_i32_0 = arith.constant 0 : i32
    return %c0_i32, %arg0 : i32, i32
  }
  func.func @transform_1(%arg0: i32) -> (i32, i32) {
    %c0_i32 = arith.constant 0 : i32
    %c0_i32_0 = arith.constant 0 : i32
    %c0_i32_1 = arith.constant 0 : i32
    return %c0_i32, %c0_i32_0 : i32, i32
  }
  func.func @transform_2(%arg0: i32) -> (i32, i32) {
    %c0_i32 = arith.constant 0 : i32
    %c0_i32_0 = arith.constant 0 : i32
    %c0_i32_1 = arith.constant 0 : i32
    return %c0_i32, %c0_i32_0 : i32, i32
  }
  func.func @transform_3(%arg0: i32) -> (i32, i32) {
    %c0_i32 = arith.constant 0 : i32
    %c0_i32_0 = arith.constant 0 : i32
    %c0_i32_1 = arith.constant 0 : i32
    return %c0_i32, %c0_i32_0 : i32, i32
  }
  func.func @transform_4(%arg0: i32) -> (i32, i32) {
    %c0_i32 = arith.constant 0 : i32
    %c0_i32_0 = arith.constant 0 : i32
    return %c0_i32, %arg0 : i32, i32
  }
  func.func @transform_5(%arg0: i32) -> (i32, i32, i32) {
    %c0_i32 = arith.constant 0 : i32
    %c0_i32_0 = arith.constant 0 : i32
    %c0_i32_1 = arith.constant 0 : i32
    return %arg0, %c0_i32, %c0_i32_0 : i32, i32, i32
  }
}

module attributes {stable_mosaic.version = 11 : i64} {
  func.func @_stage2_kernel(%arg0: i32, %arg1: memref<4x256xf32, #tpu.memory_space<vmem>>, %arg2: memref<2x4x2xf32, #tpu.memory_space<vmem>>, %arg3: memref<4x1xf32, #tpu.memory_space<vmem>>, %arg4: memref<4x1xf32, #tpu.memory_space<vmem>>, %arg5: memref<1x1xf32, #tpu.memory_space<vmem>>, %arg6: memref<9x256xf32, #tpu.memory_space<vmem>>, %arg7: memref<4x36xf32, #tpu.memory_space<vmem>>, %arg8: memref<4x1xf32, #tpu.memory_space<vmem>>, %arg9: memref<4x256xf32, #tpu.memory_space<vmem>>, %arg10: memref<1x4x2xf32, #tpu.memory_space<vmem>>) attributes {dimension_semantics = [#tpu.dimension_semantics<parallel>], iteration_bounds = array<i64: 2>, scalar_prefetch = 0 : i64, scratch_operands = 0 : i64, tpu.core_type = #tpu.core_type<tc>, window_params = [{transform_indices = @transform_0, window_bounds = array<i64: 4, 256>}, {pipeline_mode = #tpu.pipeline_mode<synchronous>, transform_indices = @transform_1, window_bounds = array<i64: 2, 4, 2>}, {pipeline_mode = #tpu.pipeline_mode<synchronous>, transform_indices = @transform_2, window_bounds = array<i64: 4, 1>}, {pipeline_mode = #tpu.pipeline_mode<synchronous>, transform_indices = @transform_3, window_bounds = array<i64: 4, 1>}, {pipeline_mode = #tpu.pipeline_mode<synchronous>, transform_indices = @transform_4, window_bounds = array<i64: 1, 1>}, {pipeline_mode = #tpu.pipeline_mode<synchronous>, transform_indices = @transform_5, window_bounds = array<i64: 9, 256>}, {pipeline_mode = #tpu.pipeline_mode<synchronous>, transform_indices = @transform_6, window_bounds = array<i64: 4, 36>}, {pipeline_mode = #tpu.pipeline_mode<synchronous>, transform_indices = @transform_7, window_bounds = array<i64: 4, 1>}, {transform_indices = @transform_8, window_bounds = array<i64: 4, 256>}, {transform_indices = @transform_9, window_bounds = array<i64: 1, 4, 2>}]} {
    %c0 = arith.constant 0 : index
    %c0_0 = arith.constant 0 : index
    %c0_1 = arith.constant 0 : index
    %0 = vector.load %arg2[%c0, %c0_0, %c0_1] : memref<2x4x2xf32, #tpu.memory_space<vmem>>, vector<2x4x2xf32>
    %c0_2 = arith.constant 0 : index
    %c0_3 = arith.constant 0 : index
    %1 = vector.load %arg3[%c0_2, %c0_3] : memref<4x1xf32, #tpu.memory_space<vmem>>, vector<4x1xf32>
    %c0_4 = arith.constant 0 : index
    %c0_5 = arith.constant 0 : index
    %2 = vector.load %arg4[%c0_4, %c0_5] : memref<4x1xf32, #tpu.memory_space<vmem>>, vector<4x1xf32>
    %cst = arith.constant dense<0.000000e+00> : vector<4x2xf32>
    %3 = vector.multi_reduction <add>, %0, %cst [0] : vector<2x4x2xf32> to vector<4x2xf32>
    %4 = vector.extract_strided_slice %3 {offsets = [0, 0], sizes = [4, 1], strides = [1, 1]} : vector<4x2xf32> to vector<4x1xf32>
    %cst_6 = arith.constant 0.001953125 : f32
    %5 = vector.broadcast %cst_6 : f32 to vector<4x1xf32>
    %6 = arith.mulf %4, %5 : vector<4x1xf32>
    %7 = vector.extract_strided_slice %3 {offsets = [0, 1], sizes = [4, 1], strides = [1, 1]} : vector<4x2xf32> to vector<4x1xf32>
    %cst_7 = arith.constant 0.001953125 : f32
    %8 = vector.broadcast %cst_7 : f32 to vector<4x1xf32>
    %9 = arith.mulf %7, %8 : vector<4x1xf32>
    %10 = arith.mulf %6, %6 : vector<4x1xf32>
    %11 = arith.subf %9, %10 : vector<4x1xf32>
    %cst_8 = arith.constant 9.99999974E-6 : f32
    %12 = vector.broadcast %cst_8 : f32 to vector<4x1xf32>
    %13 = arith.addf %11, %12 : vector<4x1xf32>
    %14 = math.rsqrt %13 : vector<4x1xf32>
    %15 = arith.mulf %1, %14 : vector<4x1xf32>
    %16 = arith.mulf %6, %15 : vector<4x1xf32>
    %17 = arith.subf %2, %16 : vector<4x1xf32>
    %c0_9 = arith.constant 0 : index
    %c0_10 = arith.constant 0 : index
    %18 = vector.load %arg1[%c0_9, %c0_10] : memref<4x256xf32, #tpu.memory_space<vmem>>, vector<4x256xf32>
    %19 = vector.broadcast %15 : vector<4x1xf32> to vector<4x256xf32>
    %20 = arith.mulf %18, %19 : vector<4x256xf32>
    %21 = vector.broadcast %17 : vector<4x1xf32> to vector<4x256xf32>
    %22 = arith.addf %20, %21 : vector<4x256xf32>
    %c0_11 = arith.constant 0 : index
    %c0_12 = arith.constant 0 : index
    %23 = vector.load %arg5[%c0_11, %c0_12] : memref<1x1xf32, #tpu.memory_space<vmem>>, vector<1x1xf32>
    %cst_13 = arith.constant 0.000000e+00 : f32
    %24 = vector.broadcast %cst_13 : f32 to vector<4x256xf32>
    %25 = arith.cmpf oge, %22, %24 : vector<4x256xf32>
    %26 = vector.broadcast %23 : vector<1x1xf32> to vector<4x256xf32>
    %27 = arith.mulf %26, %22 : vector<4x256xf32>
    %28 = arith.select %25, %22, %27 : vector<4x256xi1>, vector<4x256xf32>
    %c0_14 = arith.constant 0 : index
    %c0_15 = arith.constant 0 : index
    %29 = vector.load %arg6[%c0_14, %c0_15] : memref<9x256xf32, #tpu.memory_space<vmem>>, vector<9x256xf32>
    %c0_16 = arith.constant 0 : index
    %c0_17 = arith.constant 0 : index
    %30 = vector.load %arg7[%c0_16, %c0_17] : memref<4x36xf32, #tpu.memory_space<vmem>>, vector<4x36xf32>
    %c0_18 = arith.constant 0 : index
    %c0_19 = arith.constant 0 : index
    %31 = vector.load %arg8[%c0_18, %c0_19] : memref<4x1xf32, #tpu.memory_space<vmem>>, vector<4x1xf32>
    %cst_20 = arith.constant 0.000000e+00 : f32
    %32 = vector.broadcast %cst_20 : f32 to vector<4x256xf32>
    %c17_i32 = arith.constant 17 : i32
    %33 = tpu.dynamic_rotate %28 by %c17_i32 dim 1 : vector<4x256xf32>, i32 -> vector<4x256xf32>
    %34 = vector.extract_strided_slice %29 {offsets = [0, 0], sizes = [1, 256], strides = [1, 1]} : vector<9x256xf32> to vector<1x256xf32>
    %35 = vector.broadcast %34 : vector<1x256xf32> to vector<4x256xf32>
    %36 = arith.mulf %33, %35 : vector<4x256xf32>
    %37 = vector.extract_strided_slice %30 {offsets = [0, 0], sizes = [4, 1], strides = [1, 1]} : vector<4x36xf32> to vector<4x1xf32>
    %38 = vector.extract_strided_slice %36 {offsets = [0, 0], sizes = [1, 256], strides = [1, 1]} : vector<4x256xf32> to vector<1x256xf32>
    %39 = vector.broadcast %37 : vector<4x1xf32> to vector<4x256xf32>
    %40 = vector.broadcast %38 : vector<1x256xf32> to vector<4x256xf32>
    %41 = arith.mulf %39, %40 : vector<4x256xf32>
    %42 = arith.addf %32, %41 : vector<4x256xf32>
    %43 = vector.extract_strided_slice %30 {offsets = [0, 1], sizes = [4, 1], strides = [1, 1]} : vector<4x36xf32> to vector<4x1xf32>
    %44 = vector.extract_strided_slice %36 {offsets = [1, 0], sizes = [1, 256], strides = [1, 1]} : vector<4x256xf32> to vector<1x256xf32>
    %45 = vector.broadcast %43 : vector<4x1xf32> to vector<4x256xf32>
    %46 = vector.broadcast %44 : vector<1x256xf32> to vector<4x256xf32>
    %47 = arith.mulf %45, %46 : vector<4x256xf32>
    %48 = arith.addf %42, %47 : vector<4x256xf32>
    %49 = vector.extract_strided_slice %30 {offsets = [0, 2], sizes = [4, 1], strides = [1, 1]} : vector<4x36xf32> to vector<4x1xf32>
    %50 = vector.extract_strided_slice %36 {offsets = [2, 0], sizes = [1, 256], strides = [1, 1]} : vector<4x256xf32> to vector<1x256xf32>
    %51 = vector.broadcast %49 : vector<4x1xf32> to vector<4x256xf32>
    %52 = vector.broadcast %50 : vector<1x256xf32> to vector<4x256xf32>
    %53 = arith.mulf %51, %52 : vector<4x256xf32>
    %54 = arith.addf %48, %53 : vector<4x256xf32>
    %55 = vector.extract_strided_slice %30 {offsets = [0, 3], sizes = [4, 1], strides = [1, 1]} : vector<4x36xf32> to vector<4x1xf32>
    %56 = vector.extract_strided_slice %36 {offsets = [3, 0], sizes = [1, 256], strides = [1, 1]} : vector<4x256xf32> to vector<1x256xf32>
    %57 = vector.broadcast %55 : vector<4x1xf32> to vector<4x256xf32>
    %58 = vector.broadcast %56 : vector<1x256xf32> to vector<4x256xf32>
    %59 = arith.mulf %57, %58 : vector<4x256xf32>
    %60 = arith.addf %54, %59 : vector<4x256xf32>
    %c16_i32 = arith.constant 16 : i32
    %61 = tpu.dynamic_rotate %28 by %c16_i32 dim 1 : vector<4x256xf32>, i32 -> vector<4x256xf32>
    %62 = vector.extract_strided_slice %29 {offsets = [1, 0], sizes = [1, 256], strides = [1, 1]} : vector<9x256xf32> to vector<1x256xf32>
    %63 = vector.broadcast %62 : vector<1x256xf32> to vector<4x256xf32>
    %64 = arith.mulf %61, %63 : vector<4x256xf32>
    %65 = vector.extract_strided_slice %30 {offsets = [0, 4], sizes = [4, 1], strides = [1, 1]} : vector<4x36xf32> to vector<4x1xf32>
    %66 = vector.extract_strided_slice %64 {offsets = [0, 0], sizes = [1, 256], strides = [1, 1]} : vector<4x256xf32> to vector<1x256xf32>
    %67 = vector.broadcast %65 : vector<4x1xf32> to vector<4x256xf32>
    %68 = vector.broadcast %66 : vector<1x256xf32> to vector<4x256xf32>
    %69 = arith.mulf %67, %68 : vector<4x256xf32>
    %70 = arith.addf %60, %69 : vector<4x256xf32>
    %71 = vector.extract_strided_slice %30 {offsets = [0, 5], sizes = [4, 1], strides = [1, 1]} : vector<4x36xf32> to vector<4x1xf32>
    %72 = vector.extract_strided_slice %64 {offsets = [1, 0], sizes = [1, 256], strides = [1, 1]} : vector<4x256xf32> to vector<1x256xf32>
    %73 = vector.broadcast %71 : vector<4x1xf32> to vector<4x256xf32>
    %74 = vector.broadcast %72 : vector<1x256xf32> to vector<4x256xf32>
    %75 = arith.mulf %73, %74 : vector<4x256xf32>
    %76 = arith.addf %70, %75 : vector<4x256xf32>
    %77 = vector.extract_strided_slice %30 {offsets = [0, 6], sizes = [4, 1], strides = [1, 1]} : vector<4x36xf32> to vector<4x1xf32>
    %78 = vector.extract_strided_slice %64 {offsets = [2, 0], sizes = [1, 256], strides = [1, 1]} : vector<4x256xf32> to vector<1x256xf32>
    %79 = vector.broadcast %77 : vector<4x1xf32> to vector<4x256xf32>
    %80 = vector.broadcast %78 : vector<1x256xf32> to vector<4x256xf32>
    %81 = arith.mulf %79, %80 : vector<4x256xf32>
    %82 = arith.addf %76, %81 : vector<4x256xf32>
    %83 = vector.extract_strided_slice %30 {offsets = [0, 7], sizes = [4, 1], strides = [1, 1]} : vector<4x36xf32> to vector<4x1xf32>
    %84 = vector.extract_strided_slice %64 {offsets = [3, 0], sizes = [1, 256], strides = [1, 1]} : vector<4x256xf32> to vector<1x256xf32>
    %85 = vector.broadcast %83 : vector<4x1xf32> to vector<4x256xf32>
    %86 = vector.broadcast %84 : vector<1x256xf32> to vector<4x256xf32>
    %87 = arith.mulf %85, %86 : vector<4x256xf32>
    %88 = arith.addf %82, %87 : vector<4x256xf32>
    %c15_i32 = arith.constant 15 : i32
    %89 = tpu.dynamic_rotate %28 by %c15_i32 dim 1 : vector<4x256xf32>, i32 -> vector<4x256xf32>
    %90 = vector.extract_strided_slice %29 {offsets = [2, 0], sizes = [1, 256], strides = [1, 1]} : vector<9x256xf32> to vector<1x256xf32>
    %91 = vector.broadcast %90 : vector<1x256xf32> to vector<4x256xf32>
    %92 = arith.mulf %89, %91 : vector<4x256xf32>
    %93 = vector.extract_strided_slice %30 {offsets = [0, 8], sizes = [4, 1], strides = [1, 1]} : vector<4x36xf32> to vector<4x1xf32>
    %94 = vector.extract_strided_slice %92 {offsets = [0, 0], sizes = [1, 256], strides = [1, 1]} : vector<4x256xf32> to vector<1x256xf32>
    %95 = vector.broadcast %93 : vector<4x1xf32> to vector<4x256xf32>
    %96 = vector.broadcast %94 : vector<1x256xf32> to vector<4x256xf32>
    %97 = arith.mulf %95, %96 : vector<4x256xf32>
    %98 = arith.addf %88, %97 : vector<4x256xf32>
    %99 = vector.extract_strided_slice %30 {offsets = [0, 9], sizes = [4, 1], strides = [1, 1]} : vector<4x36xf32> to vector<4x1xf32>
    %100 = vector.extract_strided_slice %92 {offsets = [1, 0], sizes = [1, 256], strides = [1, 1]} : vector<4x256xf32> to vector<1x256xf32>
    %101 = vector.broadcast %99 : vector<4x1xf32> to vector<4x256xf32>
    %102 = vector.broadcast %100 : vector<1x256xf32> to vector<4x256xf32>
    %103 = arith.mulf %101, %102 : vector<4x256xf32>
    %104 = arith.addf %98, %103 : vector<4x256xf32>
    %105 = vector.extract_strided_slice %30 {offsets = [0, 10], sizes = [4, 1], strides = [1, 1]} : vector<4x36xf32> to vector<4x1xf32>
    %106 = vector.extract_strided_slice %92 {offsets = [2, 0], sizes = [1, 256], strides = [1, 1]} : vector<4x256xf32> to vector<1x256xf32>
    %107 = vector.broadcast %105 : vector<4x1xf32> to vector<4x256xf32>
    %108 = vector.broadcast %106 : vector<1x256xf32> to vector<4x256xf32>
    %109 = arith.mulf %107, %108 : vector<4x256xf32>
    %110 = arith.addf %104, %109 : vector<4x256xf32>
    %111 = vector.extract_strided_slice %30 {offsets = [0, 11], sizes = [4, 1], strides = [1, 1]} : vector<4x36xf32> to vector<4x1xf32>
    %112 = vector.extract_strided_slice %92 {offsets = [3, 0], sizes = [1, 256], strides = [1, 1]} : vector<4x256xf32> to vector<1x256xf32>
    %113 = vector.broadcast %111 : vector<4x1xf32> to vector<4x256xf32>
    %114 = vector.broadcast %112 : vector<1x256xf32> to vector<4x256xf32>
    %115 = arith.mulf %113, %114 : vector<4x256xf32>
    %116 = arith.addf %110, %115 : vector<4x256xf32>
    %c1_i32 = arith.constant 1 : i32
    %117 = tpu.dynamic_rotate %28 by %c1_i32 dim 1 : vector<4x256xf32>, i32 -> vector<4x256xf32>
    %118 = vector.extract_strided_slice %29 {offsets = [3, 0], sizes = [1, 256], strides = [1, 1]} : vector<9x256xf32> to vector<1x256xf32>
    %119 = vector.broadcast %118 : vector<1x256xf32> to vector<4x256xf32>
    %120 = arith.mulf %117, %119 : vector<4x256xf32>
    %121 = vector.extract_strided_slice %30 {offsets = [0, 12], sizes = [4, 1], strides = [1, 1]} : vector<4x36xf32> to vector<4x1xf32>
    %122 = vector.extract_strided_slice %120 {offsets = [0, 0], sizes = [1, 256], strides = [1, 1]} : vector<4x256xf32> to vector<1x256xf32>
    %123 = vector.broadcast %121 : vector<4x1xf32> to vector<4x256xf32>
    %124 = vector.broadcast %122 : vector<1x256xf32> to vector<4x256xf32>
    %125 = arith.mulf %123, %124 : vector<4x256xf32>
    %126 = arith.addf %116, %125 : vector<4x256xf32>
    %127 = vector.extract_strided_slice %30 {offsets = [0, 13], sizes = [4, 1], strides = [1, 1]} : vector<4x36xf32> to vector<4x1xf32>
    %128 = vector.extract_strided_slice %120 {offsets = [1, 0], sizes = [1, 256], strides = [1, 1]} : vector<4x256xf32> to vector<1x256xf32>
    %129 = vector.broadcast %127 : vector<4x1xf32> to vector<4x256xf32>
    %130 = vector.broadcast %128 : vector<1x256xf32> to vector<4x256xf32>
    %131 = arith.mulf %129, %130 : vector<4x256xf32>
    %132 = arith.addf %126, %131 : vector<4x256xf32>
    %133 = vector.extract_strided_slice %30 {offsets = [0, 14], sizes = [4, 1], strides = [1, 1]} : vector<4x36xf32> to vector<4x1xf32>
    %134 = vector.extract_strided_slice %120 {offsets = [2, 0], sizes = [1, 256], strides = [1, 1]} : vector<4x256xf32> to vector<1x256xf32>
    %135 = vector.broadcast %133 : vector<4x1xf32> to vector<4x256xf32>
    %136 = vector.broadcast %134 : vector<1x256xf32> to vector<4x256xf32>
    %137 = arith.mulf %135, %136 : vector<4x256xf32>
    %138 = arith.addf %132, %137 : vector<4x256xf32>
    %139 = vector.extract_strided_slice %30 {offsets = [0, 15], sizes = [4, 1], strides = [1, 1]} : vector<4x36xf32> to vector<4x1xf32>
    %140 = vector.extract_strided_slice %120 {offsets = [3, 0], sizes = [1, 256], strides = [1, 1]} : vector<4x256xf32> to vector<1x256xf32>
    %141 = vector.broadcast %139 : vector<4x1xf32> to vector<4x256xf32>
    %142 = vector.broadcast %140 : vector<1x256xf32> to vector<4x256xf32>
    %143 = arith.mulf %141, %142 : vector<4x256xf32>
    %144 = arith.addf %138, %143 : vector<4x256xf32>
    %145 = vector.extract_strided_slice %30 {offsets = [0, 16], sizes = [4, 1], strides = [1, 1]} : vector<4x36xf32> to vector<4x1xf32>
    %146 = vector.extract_strided_slice %28 {offsets = [0, 0], sizes = [1, 256], strides = [1, 1]} : vector<4x256xf32> to vector<1x256xf32>
    %147 = vector.broadcast %145 : vector<4x1xf32> to vector<4x256xf32>
    %148 = vector.broadcast %146 : vector<1x256xf32> to vector<4x256xf32>
    %149 = arith.mulf %147, %148 : vector<4x256xf32>
    %150 = arith.addf %144, %149 : vector<4x256xf32>
    %151 = vector.extract_strided_slice %30 {offsets = [0, 17], sizes = [4, 1], strides = [1, 1]} : vector<4x36xf32> to vector<4x1xf32>
    %152 = vector.extract_strided_slice %28 {offsets = [1, 0], sizes = [1, 256], strides = [1, 1]} : vector<4x256xf32> to vector<1x256xf32>
    %153 = vector.broadcast %151 : vector<4x1xf32> to vector<4x256xf32>
    %154 = vector.broadcast %152 : vector<1x256xf32> to vector<4x256xf32>
    %155 = arith.mulf %153, %154 : vector<4x256xf32>
    %156 = arith.addf %150, %155 : vector<4x256xf32>
    %157 = vector.extract_strided_slice %30 {offsets = [0, 18], sizes = [4, 1], strides = [1, 1]} : vector<4x36xf32> to vector<4x1xf32>
    %158 = vector.extract_strided_slice %28 {offsets = [2, 0], sizes = [1, 256], strides = [1, 1]} : vector<4x256xf32> to vector<1x256xf32>
    %159 = vector.broadcast %157 : vector<4x1xf32> to vector<4x256xf32>
    %160 = vector.broadcast %158 : vector<1x256xf32> to vector<4x256xf32>
    %161 = arith.mulf %159, %160 : vector<4x256xf32>
    %162 = arith.addf %156, %161 : vector<4x256xf32>
    %163 = vector.extract_strided_slice %30 {offsets = [0, 19], sizes = [4, 1], strides = [1, 1]} : vector<4x36xf32> to vector<4x1xf32>
    %164 = vector.extract_strided_slice %28 {offsets = [3, 0], sizes = [1, 256], strides = [1, 1]} : vector<4x256xf32> to vector<1x256xf32>
    %165 = vector.broadcast %163 : vector<4x1xf32> to vector<4x256xf32>
    %166 = vector.broadcast %164 : vector<1x256xf32> to vector<4x256xf32>
    %167 = arith.mulf %165, %166 : vector<4x256xf32>
    %168 = arith.addf %162, %167 : vector<4x256xf32>
    %c255_i32 = arith.constant 255 : i32
    %169 = tpu.dynamic_rotate %28 by %c255_i32 dim 1 : vector<4x256xf32>, i32 -> vector<4x256xf32>
    %170 = vector.extract_strided_slice %29 {offsets = [5, 0], sizes = [1, 256], strides = [1, 1]} : vector<9x256xf32> to vector<1x256xf32>
    %171 = vector.broadcast %170 : vector<1x256xf32> to vector<4x256xf32>
    %172 = arith.mulf %169, %171 : vector<4x256xf32>
    %173 = vector.extract_strided_slice %30 {offsets = [0, 20], sizes = [4, 1], strides = [1, 1]} : vector<4x36xf32> to vector<4x1xf32>
    %174 = vector.extract_strided_slice %172 {offsets = [0, 0], sizes = [1, 256], strides = [1, 1]} : vector<4x256xf32> to vector<1x256xf32>
    %175 = vector.broadcast %173 : vector<4x1xf32> to vector<4x256xf32>
    %176 = vector.broadcast %174 : vector<1x256xf32> to vector<4x256xf32>
    %177 = arith.mulf %175, %176 : vector<4x256xf32>
    %178 = arith.addf %168, %177 : vector<4x256xf32>
    %179 = vector.extract_strided_slice %30 {offsets = [0, 21], sizes = [4, 1], strides = [1, 1]} : vector<4x36xf32> to vector<4x1xf32>
    %180 = vector.extract_strided_slice %172 {offsets = [1, 0], sizes = [1, 256], strides = [1, 1]} : vector<4x256xf32> to vector<1x256xf32>
    %181 = vector.broadcast %179 : vector<4x1xf32> to vector<4x256xf32>
    %182 = vector.broadcast %180 : vector<1x256xf32> to vector<4x256xf32>
    %183 = arith.mulf %181, %182 : vector<4x256xf32>
    %184 = arith.addf %178, %183 : vector<4x256xf32>
    %185 = vector.extract_strided_slice %30 {offsets = [0, 22], sizes = [4, 1], strides = [1, 1]} : vector<4x36xf32> to vector<4x1xf32>
    %186 = vector.extract_strided_slice %172 {offsets = [2, 0], sizes = [1, 256], strides = [1, 1]} : vector<4x256xf32> to vector<1x256xf32>
    %187 = vector.broadcast %185 : vector<4x1xf32> to vector<4x256xf32>
    %188 = vector.broadcast %186 : vector<1x256xf32> to vector<4x256xf32>
    %189 = arith.mulf %187, %188 : vector<4x256xf32>
    %190 = arith.addf %184, %189 : vector<4x256xf32>
    %191 = vector.extract_strided_slice %30 {offsets = [0, 23], sizes = [4, 1], strides = [1, 1]} : vector<4x36xf32> to vector<4x1xf32>
    %192 = vector.extract_strided_slice %172 {offsets = [3, 0], sizes = [1, 256], strides = [1, 1]} : vector<4x256xf32> to vector<1x256xf32>
    %193 = vector.broadcast %191 : vector<4x1xf32> to vector<4x256xf32>
    %194 = vector.broadcast %192 : vector<1x256xf32> to vector<4x256xf32>
    %195 = arith.mulf %193, %194 : vector<4x256xf32>
    %196 = arith.addf %190, %195 : vector<4x256xf32>
    %c241_i32 = arith.constant 241 : i32
    %197 = tpu.dynamic_rotate %28 by %c241_i32 dim 1 : vector<4x256xf32>, i32 -> vector<4x256xf32>
    %198 = vector.extract_strided_slice %29 {offsets = [6, 0], sizes = [1, 256], strides = [1, 1]} : vector<9x256xf32> to vector<1x256xf32>
    %199 = vector.broadcast %198 : vector<1x256xf32> to vector<4x256xf32>
    %200 = arith.mulf %197, %199 : vector<4x256xf32>
    %201 = vector.extract_strided_slice %30 {offsets = [0, 24], sizes = [4, 1], strides = [1, 1]} : vector<4x36xf32> to vector<4x1xf32>
    %202 = vector.extract_strided_slice %200 {offsets = [0, 0], sizes = [1, 256], strides = [1, 1]} : vector<4x256xf32> to vector<1x256xf32>
    %203 = vector.broadcast %201 : vector<4x1xf32> to vector<4x256xf32>
    %204 = vector.broadcast %202 : vector<1x256xf32> to vector<4x256xf32>
    %205 = arith.mulf %203, %204 : vector<4x256xf32>
    %206 = arith.addf %196, %205 : vector<4x256xf32>
    %207 = vector.extract_strided_slice %30 {offsets = [0, 25], sizes = [4, 1], strides = [1, 1]} : vector<4x36xf32> to vector<4x1xf32>
    %208 = vector.extract_strided_slice %200 {offsets = [1, 0], sizes = [1, 256], strides = [1, 1]} : vector<4x256xf32> to vector<1x256xf32>
    %209 = vector.broadcast %207 : vector<4x1xf32> to vector<4x256xf32>
    %210 = vector.broadcast %208 : vector<1x256xf32> to vector<4x256xf32>
    %211 = arith.mulf %209, %210 : vector<4x256xf32>
    %212 = arith.addf %206, %211 : vector<4x256xf32>
    %213 = vector.extract_strided_slice %30 {offsets = [0, 26], sizes = [4, 1], strides = [1, 1]} : vector<4x36xf32> to vector<4x1xf32>
    %214 = vector.extract_strided_slice %200 {offsets = [2, 0], sizes = [1, 256], strides = [1, 1]} : vector<4x256xf32> to vector<1x256xf32>
    %215 = vector.broadcast %213 : vector<4x1xf32> to vector<4x256xf32>
    %216 = vector.broadcast %214 : vector<1x256xf32> to vector<4x256xf32>
    %217 = arith.mulf %215, %216 : vector<4x256xf32>
    %218 = arith.addf %212, %217 : vector<4x256xf32>
    %219 = vector.extract_strided_slice %30 {offsets = [0, 27], sizes = [4, 1], strides = [1, 1]} : vector<4x36xf32> to vector<4x1xf32>
    %220 = vector.extract_strided_slice %200 {offsets = [3, 0], sizes = [1, 256], strides = [1, 1]} : vector<4x256xf32> to vector<1x256xf32>
    %221 = vector.broadcast %219 : vector<4x1xf32> to vector<4x256xf32>
    %222 = vector.broadcast %220 : vector<1x256xf32> to vector<4x256xf32>
    %223 = arith.mulf %221, %222 : vector<4x256xf32>
    %224 = arith.addf %218, %223 : vector<4x256xf32>
    %c240_i32 = arith.constant 240 : i32
    %225 = tpu.dynamic_rotate %28 by %c240_i32 dim 1 : vector<4x256xf32>, i32 -> vector<4x256xf32>
    %226 = vector.extract_strided_slice %29 {offsets = [7, 0], sizes = [1, 256], strides = [1, 1]} : vector<9x256xf32> to vector<1x256xf32>
    %227 = vector.broadcast %226 : vector<1x256xf32> to vector<4x256xf32>
    %228 = arith.mulf %225, %227 : vector<4x256xf32>
    %229 = vector.extract_strided_slice %30 {offsets = [0, 28], sizes = [4, 1], strides = [1, 1]} : vector<4x36xf32> to vector<4x1xf32>
    %230 = vector.extract_strided_slice %228 {offsets = [0, 0], sizes = [1, 256], strides = [1, 1]} : vector<4x256xf32> to vector<1x256xf32>
    %231 = vector.broadcast %229 : vector<4x1xf32> to vector<4x256xf32>
    %232 = vector.broadcast %230 : vector<1x256xf32> to vector<4x256xf32>
    %233 = arith.mulf %231, %232 : vector<4x256xf32>
    %234 = arith.addf %224, %233 : vector<4x256xf32>
    %235 = vector.extract_strided_slice %30 {offsets = [0, 29], sizes = [4, 1], strides = [1, 1]} : vector<4x36xf32> to vector<4x1xf32>
    %236 = vector.extract_strided_slice %228 {offsets = [1, 0], sizes = [1, 256], strides = [1, 1]} : vector<4x256xf32> to vector<1x256xf32>
    %237 = vector.broadcast %235 : vector<4x1xf32> to vector<4x256xf32>
    %238 = vector.broadcast %236 : vector<1x256xf32> to vector<4x256xf32>
    %239 = arith.mulf %237, %238 : vector<4x256xf32>
    %240 = arith.addf %234, %239 : vector<4x256xf32>
    %241 = vector.extract_strided_slice %30 {offsets = [0, 30], sizes = [4, 1], strides = [1, 1]} : vector<4x36xf32> to vector<4x1xf32>
    %242 = vector.extract_strided_slice %228 {offsets = [2, 0], sizes = [1, 256], strides = [1, 1]} : vector<4x256xf32> to vector<1x256xf32>
    %243 = vector.broadcast %241 : vector<4x1xf32> to vector<4x256xf32>
    %244 = vector.broadcast %242 : vector<1x256xf32> to vector<4x256xf32>
    %245 = arith.mulf %243, %244 : vector<4x256xf32>
    %246 = arith.addf %240, %245 : vector<4x256xf32>
    %247 = vector.extract_strided_slice %30 {offsets = [0, 31], sizes = [4, 1], strides = [1, 1]} : vector<4x36xf32> to vector<4x1xf32>
    %248 = vector.extract_strided_slice %228 {offsets = [3, 0], sizes = [1, 256], strides = [1, 1]} : vector<4x256xf32> to vector<1x256xf32>
    %249 = vector.broadcast %247 : vector<4x1xf32> to vector<4x256xf32>
    %250 = vector.broadcast %248 : vector<1x256xf32> to vector<4x256xf32>
    %251 = arith.mulf %249, %250 : vector<4x256xf32>
    %252 = arith.addf %246, %251 : vector<4x256xf32>
    %c239_i32 = arith.constant 239 : i32
    %253 = tpu.dynamic_rotate %28 by %c239_i32 dim 1 : vector<4x256xf32>, i32 -> vector<4x256xf32>
    %254 = vector.extract_strided_slice %29 {offsets = [8, 0], sizes = [1, 256], strides = [1, 1]} : vector<9x256xf32> to vector<1x256xf32>
    %255 = vector.broadcast %254 : vector<1x256xf32> to vector<4x256xf32>
    %256 = arith.mulf %253, %255 : vector<4x256xf32>
    %257 = vector.extract_strided_slice %30 {offsets = [0, 32], sizes = [4, 1], strides = [1, 1]} : vector<4x36xf32> to vector<4x1xf32>
    %258 = vector.extract_strided_slice %256 {offsets = [0, 0], sizes = [1, 256], strides = [1, 1]} : vector<4x256xf32> to vector<1x256xf32>
    %259 = vector.broadcast %257 : vector<4x1xf32> to vector<4x256xf32>
    %260 = vector.broadcast %258 : vector<1x256xf32> to vector<4x256xf32>
    %261 = arith.mulf %259, %260 : vector<4x256xf32>
    %262 = arith.addf %252, %261 : vector<4x256xf32>
    %263 = vector.extract_strided_slice %30 {offsets = [0, 33], sizes = [4, 1], strides = [1, 1]} : vector<4x36xf32> to vector<4x1xf32>
    %264 = vector.extract_strided_slice %256 {offsets = [1, 0], sizes = [1, 256], strides = [1, 1]} : vector<4x256xf32> to vector<1x256xf32>
    %265 = vector.broadcast %263 : vector<4x1xf32> to vector<4x256xf32>
    %266 = vector.broadcast %264 : vector<1x256xf32> to vector<4x256xf32>
    %267 = arith.mulf %265, %266 : vector<4x256xf32>
    %268 = arith.addf %262, %267 : vector<4x256xf32>
    %269 = vector.extract_strided_slice %30 {offsets = [0, 34], sizes = [4, 1], strides = [1, 1]} : vector<4x36xf32> to vector<4x1xf32>
    %270 = vector.extract_strided_slice %256 {offsets = [2, 0], sizes = [1, 256], strides = [1, 1]} : vector<4x256xf32> to vector<1x256xf32>
    %271 = vector.broadcast %269 : vector<4x1xf32> to vector<4x256xf32>
    %272 = vector.broadcast %270 : vector<1x256xf32> to vector<4x256xf32>
    %273 = arith.mulf %271, %272 : vector<4x256xf32>
    %274 = arith.addf %268, %273 : vector<4x256xf32>
    %275 = vector.extract_strided_slice %30 {offsets = [0, 35], sizes = [4, 1], strides = [1, 1]} : vector<4x36xf32> to vector<4x1xf32>
    %276 = vector.extract_strided_slice %256 {offsets = [3, 0], sizes = [1, 256], strides = [1, 1]} : vector<4x256xf32> to vector<1x256xf32>
    %277 = vector.broadcast %275 : vector<4x1xf32> to vector<4x256xf32>
    %278 = vector.broadcast %276 : vector<1x256xf32> to vector<4x256xf32>
    %279 = arith.mulf %277, %278 : vector<4x256xf32>
    %280 = arith.addf %274, %279 : vector<4x256xf32>
    %281 = vector.broadcast %31 : vector<4x1xf32> to vector<4x256xf32>
    %282 = arith.addf %280, %281 : vector<4x256xf32>
    %c0_21 = arith.constant 0 : index
    %c0_22 = arith.constant 0 : index
    %283 = vector.load %arg9[%c0_21, %c0_22] : memref<4x256xf32, #tpu.memory_space<vmem>>, vector<4x256xf32>
    tpu.vector_store %arg9[%c0_21, %c0_22], %282 {strides = array<i32>} : memref<4x256xf32, #tpu.memory_space<vmem>>, vector<4x256xf32>,
    %cst_23 = arith.constant dense<0.000000e+00> : vector<4xf32>
    %284 = vector.multi_reduction <add>, %282, %cst_23 [1] : vector<4x256xf32> to vector<4xf32>
    %285 = vector.shape_cast %284 : vector<4xf32> to vector<4x1xf32>
    %c0_24 = arith.constant 0 : index
    %c0_25 = arith.constant 0 : index
    %c0_26 = arith.constant 0 : index
    %286 = vector.load %arg10[%c0_24, %c0_25, %c0_26] : memref<1x4x2xf32, #tpu.memory_space<vmem>>, vector<1x4x1xf32>
    %287 = vector.shape_cast %286 : vector<1x4x1xf32> to vector<4x1xf32>
    %288 = vector.shape_cast %285 : vector<4x1xf32> to vector<1x4x1xf32>
    tpu.vector_store %arg10[%c0_24, %c0_25, %c0_26], %288 {strides = array<i32>} : memref<1x4x2xf32, #tpu.memory_space<vmem>>, vector<1x4x1xf32>,
    %289 = arith.mulf %282, %282 : vector<4x256xf32>
    %cst_27 = arith.constant dense<0.000000e+00> : vector<4xf32>
    %290 = vector.multi_reduction <add>, %289, %cst_27 [1] : vector<4x256xf32> to vector<4xf32>
    %291 = vector.shape_cast %290 : vector<4xf32> to vector<4x1xf32>
    %c0_28 = arith.constant 0 : index
    %c0_29 = arith.constant 0 : index
    %c1 = arith.constant 1 : index
    %292 = vector.load %arg10[%c0_28, %c0_29, %c1] : memref<1x4x2xf32, #tpu.memory_space<vmem>>, vector<1x4x1xf32>
    %293 = vector.shape_cast %292 : vector<1x4x1xf32> to vector<4x1xf32>
    %294 = vector.shape_cast %291 : vector<4x1xf32> to vector<1x4x1xf32>
    tpu.vector_store %arg10[%c0_28, %c0_29, %c1], %294 {strides = array<i32>} : memref<1x4x2xf32, #tpu.memory_space<vmem>>, vector<1x4x1xf32>,
    return
  }
  func.func @transform_0(%arg0: i32) -> (i32, i32) {
    %c0_i32 = arith.constant 0 : i32
    %c0_i32_0 = arith.constant 0 : i32
    return %c0_i32, %arg0 : i32, i32
  }
  func.func @transform_1(%arg0: i32) -> (i32, i32, i32) {
    %c0_i32 = arith.constant 0 : i32
    %c0_i32_0 = arith.constant 0 : i32
    %c0_i32_1 = arith.constant 0 : i32
    %c0_i32_2 = arith.constant 0 : i32
    return %c0_i32, %c0_i32_0, %c0_i32_1 : i32, i32, i32
  }
  func.func @transform_2(%arg0: i32) -> (i32, i32) {
    %c0_i32 = arith.constant 0 : i32
    %c0_i32_0 = arith.constant 0 : i32
    %c0_i32_1 = arith.constant 0 : i32
    return %c0_i32, %c0_i32_0 : i32, i32
  }
  func.func @transform_3(%arg0: i32) -> (i32, i32) {
    %c0_i32 = arith.constant 0 : i32
    %c0_i32_0 = arith.constant 0 : i32
    %c0_i32_1 = arith.constant 0 : i32
    return %c0_i32, %c0_i32_0 : i32, i32
  }
  func.func @transform_4(%arg0: i32) -> (i32, i32) {
    %c0_i32 = arith.constant 0 : i32
    %c0_i32_0 = arith.constant 0 : i32
    %c0_i32_1 = arith.constant 0 : i32
    return %c0_i32, %c0_i32_0 : i32, i32
  }
  func.func @transform_5(%arg0: i32) -> (i32, i32) {
    %c0_i32 = arith.constant 0 : i32
    %c0_i32_0 = arith.constant 0 : i32
    %c0_i32_1 = arith.constant 0 : i32
    return %c0_i32, %c0_i32_0 : i32, i32
  }
  func.func @transform_6(%arg0: i32) -> (i32, i32) {
    %c0_i32 = arith.constant 0 : i32
    %c0_i32_0 = arith.constant 0 : i32
    %c0_i32_1 = arith.constant 0 : i32
    return %c0_i32, %c0_i32_0 : i32, i32
  }
  func.func @transform_7(%arg0: i32) -> (i32, i32) {
    %c0_i32 = arith.constant 0 : i32
    %c0_i32_0 = arith.constant 0 : i32
    %c0_i32_1 = arith.constant 0 : i32
    return %c0_i32, %c0_i32_0 : i32, i32
  }
  func.func @transform_8(%arg0: i32) -> (i32, i32) {
    %c0_i32 = arith.constant 0 : i32
    %c0_i32_0 = arith.constant 0 : i32
    return %c0_i32, %arg0 : i32, i32
  }
  func.func @transform_9(%arg0: i32) -> (i32, i32, i32) {
    %c0_i32 = arith.constant 0 : i32
    %c0_i32_0 = arith.constant 0 : i32
    %c0_i32_1 = arith.constant 0 : i32
    return %arg0, %c0_i32, %c0_i32_0 : i32, i32, i32
  }
}

</mosaic_0001>

<bundles_post_ra>
// kernel: residual_block.5
= control target key start
LH: loop header
LB: loop body
LE: loop exit
PB: predicated region body
PF: predicated region fallthrough
CT: control target
= control target key end

     0   :  { %s443_s18 = smov 0   ;;  %s477_s0 = inlined_call_operand.vmem [shape: f32[4,512], index: 0, kind: input, shape index: {}, may-alias: {0,5}]   ;;  %s478_s1 = inlined_call_operand.vmem [shape: f32[4,512], index: 1, kind: input, shape index: {}]   ;;  %s479_s2 = inlined_call_operand.vmem [shape: f32[2,4,2], index: 2, kind: input, shape index: {}]   ;;  %s480_s3 = inlined_call_operand.vmem [shape: f32[4,1], index: 3, kind: input, shape index: {}]   ;;  %s481_s4 = inlined_call_operand.vmem [shape: f32[4,1], index: 4, kind: input, shape index: {}]   ;;  %s482_s5 = inlined_call_operand.vmem [shape: f32[4,512], index: 5, kind: output, shape index: {}, may-alias: {0,5}]  }
   0x1 LB: > { %s372_s19 = sadd.s32 4294967295, %s407_s18   ;;  %p376_p0 = scmp.ge.s32.totalorder %s407_s18, 1  ;;  %s407_s18 = sphi %s443_s18, %s15_s18  }
   0x2   : > { %p199_p1 = scmp.lt.s32.totalorder %s407_s18, 3 }
   0x4   : > { %p200_p2 = pnand %p376_p0, %p199_p1 }
   0x5   : > { %s409_s24 = smov (!%p200_p2), 1   ;;  %s411_s25 = smov (!%p200_p2), 127  }
   0x6   : > { %203 = sbr.rel (%p200_p2) target bundleno = 404 (0x194), region = 40  ;;  %s377_s30 = sshll.u32 (!%p200_p2), %s372_s19, 1 }
   0x7   : > { %p233_p3 = scmp.lt.s32.totalorder (!%p200_p2), %s377_s30, 3 }
   0xb   : > { %v250_v0 = vld [vmem:[%s479_s2] sm:$0xf]  ;;  %v251_v1 = vld [vmem:[%s479_s2 + $0x4] sm:$0xf]  ;;  %vm254_vm0 = vcmask 11264   ;;  %v410_v10 = vmov 0   ;;  %v282_v20 = vlaneseq }
   0xc   : > { %v255_v2 = vsel %vm254_vm0, %v250_v0, 0.0  ;;  %v256_v3 = vsel %vm254_vm0, %v251_v1, 0.0  ;;  %397 = vset.pattern.permute.xlu1 %v410_v10  ;;  %398 = vset.pattern.permute.xlu0 %v410_v10  ;;  %v252_v12 = vld [vmem:[%s480_s3] sm:$0xf]  ;;  %v412_v18 = vmov 839922192  }
   0xd   : > { %v257_v4 = vadd.f32 %v256_v3, %v255_v2  ;;  %v253_v15 = vld [vmem:[%s481_s4] sm:$0xf]  ;;  %v280_v19 = vunpack.c.l.s4 %v412_v18  ;;  %s484_s30 = smov (!%p233_p3, %s377_s30), 3  ;;  %v283_v22 = vshrl.u32 %v282_v20, 7 }
   0xe   : > { %s378_s6 = sshll.u32 %s484_s30, 2 }
   0xf   : > { %v258_v5 = vmul.f32 0.001953125, %v257_v4  ;;  %v281_v21 = vunpack.c.0.s8 %v280_v19  ;;  %s236_s9 = scalar_lea.vmem %s477_s0, %s378_s6  ;;  %s242_s12 = scalar_lea.vmem %s478_s1, %s378_s6 }
  0x10   : > { %v274_v26 = vld [vmem:[%s236_s9] sm:$0xff]  ;;  %s248_s15 = scalar_lea.vmem %s482_s5, %s378_s6 }
  0x11   : > { %v259_v6 = vmul.f32 %v258_v5, %v258_v5  ;;  %v284_v23 = vsub.s32 %v281_v21, %v283_v22  ;;  %v301_v30 = vld [vmem:[%s242_s12] sm:$0xff] }
  0x13   : > { %261 = vrot.lane.b32.xlu0 %v259_v6, %s409_s24 }
  0x85   : > { %v262_v7 = vpop.permute.xlu0 %261 }
  0x86   : > { %v264_v8 = vsub.f32 %v258_v5, %v262_v7 }
  0x88   : > { %v265_v9 = vadd.f32 1e-05, %v264_v8 }
  0x8a   : > { %399 = vrsqrt.f32 %v265_v9 }
  0x97   : > { %v400_v11 = vpop.eup %399 }
  0x98   : > { %268 = vrot.lane.b32.xlu0 %v400_v11, %s411_s25 }
 0x10a   : > { %v269_v13 = vpop.permute.xlu0 %268 }
 0x10b   : > { %v271_v14 = vmul.f32 %v269_v13, %v252_v12 }
 0x10d   : > { %v272_v16 = vmul.f32 %v271_v14, %v258_v5  ;;  %277 = vperm.xlu1 %397, %v271_v14  }
 0x10f   : > { %v273_v17 = vsub.f32 %v253_v15, %v272_v16 }
 0x111   : > { %290 = vperm.xlu1 %397, %v273_v17  }
 0x188   : > { %v278_v24 = vpop.permute.xlu1 %277 }
 0x189   : > { %v285_v25 = vrot.slane %v278_v24, %v284_v23 }
 0x18b   : > { %v287_v28 = vmul.f32 %v285_v25, %v274_v26 }
 0x18c   : > { %v291_v27 = vpop.permute.xlu1 %290 }
 0x18d   : > { %v298_v29 = vrot.slane %v291_v27, %v284_v23 }
 0x18f   : > { %v300_v31 = vadd.f32 %v298_v29, %v287_v28 }
 0x191   : > { %v302_v32 = vadd.f32 %v301_v30, %v300_v31 }
 0x193   : > { %303 = vst [vmem:[%s248_s15] sm:$0xff] %v302_v32 }
 0x194 PF: > { %s15_s18 = sadd.s32 1, %s407_s18  }
 0x195   : > { %p12_p4 = scmp.ge.s32.totalorder %s15_s18, 4  }
 0x197   :  { %14 = sbr.rel (!%p12_p4) target bundleno = 1 (0x1), region = 73 }

// kernel: residual_block.3
= control target key start
LH: loop header
LB: loop body
LE: loop exit
PB: predicated region body
PF: predicated region fallthrough
CT: control target
= control target key end

     0   :  { %s1307_s18 = smov 0   ;;  %s1570_s0 = inlined_call_operand.vmem [shape: f32[4,512], index: 0, kind: input, shape index: {}]   ;;  %s1571_s1 = inlined_call_operand.vmem [shape: f32[9,256], index: 1, kind: input, shape index: {}]   ;;  %s1572_s2 = inlined_call_operand.vmem [shape: f32[4,36], index: 2, kind: input, shape index: {}]   ;;  %s1573_s3 = inlined_call_operand.vmem [shape: f32[4,1], index: 3, kind: input, shape index: {}]   ;;  %s1574_s4 = inlined_call_operand.vmem [shape: f32[4,512], index: 4, kind: output, shape index: {0}]   ;;  %s1575_s5 = inlined_call_operand.vmem [shape: f32[2,4,2], index: 5, kind: output, shape index: {1}]  }
   0x1 LB: > { %s1313_s19 = sadd.s32 4294967295, %s1231_s18   ;;  %p1124_p0 = scmp.ge.s32.totalorder %s1231_s18, 1  ;;  %s1231_s18 = sphi %s1307_s18, %s16_s18  }
   0x2   : > { %p191_p1 = scmp.lt.s32.totalorder %s1231_s18, 3 }
   0x4   : > { %p192_p2 = pnand %p1124_p0, %p191_p1 }
   0x5   : > { %s1125_s22 = sshll.u32 (!%p192_p2), %s1313_s19, 1  ;;  %s1236_s27 = smov (!%p192_p2), 17  }
   0x6   : > { %195 = sbr.rel (%p192_p2) target bundleno = 428 (0x1ac), region = 36  ;;  %p224_p3 = scmp.lt.s32.totalorder (!%p192_p2), %s1125_s22, 3 }
   0x7   : > { %s1238_s28 = smov (!%p192_p2), 16   ;;  %s1242_s29 = smov (!%p192_p2), 15  }
   0x8   : > { %s1250_s30 = smov (!%p192_p2), 1   ;;  %s1253_s6 = smov (!%p192_p2), 127  }
   0x9   : > { %s1257_s7 = smov (!%p192_p2), 113   ;;  %s1271_s8 = smov (!%p192_p2), 112  }
   0xa   : > { %s1274_s9 = smov (!%p192_p2), 111   ;;  %p235_p4 = scmp.lt.s32.totalorder (!%p192_p2), %s1313_s19, 1 }
   0xb   : > { %v1320_v0 = vld [vmem:[%s1572_s2] sm:$0xf]  ;;  %v1233_v1 = vmov 0   ;;  %v1234_v2 = vmov 2   ;;  %s1577_s22 = smov (!%p224_p3, %s1125_s22), 3  ;;  %v1235_v3 = vmov 1   ;;  %v253_v38 = vlaneseq }
   0xc   : > { %1186 = vset.pattern.permute.xlu1 %v1233_v1  ;;  %1188 = vset.pattern.permute.xlu0 %v1234_v2  ;;  %s1126_s23 = sshll.u32 %s1577_s22, 2  ;;  %v1237_v6 = vmov 3   ;;  %v1239_v7 = vmov 4   ;;  %v1240_v8 = vmov 5   ;;  %v1241_v9 = vmov 6   ;;  %v1402_v46 = vld [vmem:[%s1571_s1] sm:$0xff] }
   0xd   : > { %270 = vperm.xlu1 %1186, %v1320_v0   ;;  %s227_s26 = scalar_lea.vmem %s1570_s0, %s1126_s23  ;;  %v1243_v10 = vmov 7   ;;  %v1244_v11 = vmov 8   ;;  %v1245_v12 = vmov 9   ;;  %v1246_v13 = vmov 11   ;;  %v1407_v47 = vld [vmem:[%s1571_s1 + $0x8] sm:$0xff]  ;;  %s1579_s19 = smov (!%p235_p4, %s1313_s19), 1 }
   0xe   : > { %v1334_v4 = vld [vmem:[%s227_s26] sm:$0xff]  ;;  %v1247_v14 = vmov 12   ;;  %v1248_v15 = vmov 10   ;;  %v1249_v16 = vmov 15   ;;  %v1251_v17 = vmov 13   ;;  %s233_s26 = scalar_lea.vmem %s1574_s4, %s1126_s23 }
   0xf   : > { %249 = vrot.lane.b32.xlu0 %v1334_v4, %s1236_s27  ;;  %v1339_v5 = vcombine.high %v1334_v4, %v1334_v4  ;;  %v1252_v18 = vmov 18   ;;  %v1254_v19 = vmov 21   ;;  %v1255_v20 = vmov 14   ;;  %v245_v56 = vld [vmem:[%s1573_s3] sm:$0xf] }
  0x10   : > { %v1256_v21 = vmov 16   ;;  %v1258_v22 = vmov 24   ;;  %v1259_v23 = vmov 17   ;;  %v1260_v24 = vmov 27  }
  0x11   : > { %1187 = vset.pattern.permute.xlu1 %v1235_v3  ;;  %v1261_v25 = vmov 19   ;;  %v1262_v26 = vmov 28   ;;  %v1263_v27 = vmov 20   ;;  %v1264_v28 = vmov 31  }
  0x12   : > { %286 = vperm.xlu1 %1187, %v1320_v0   ;;  %v1265_v29 = vmov 22   ;;  %v1266_v30 = vmov 32   ;;  %v1267_v31 = vmov 23   ;;  %v1268_v32 = vmov 35  }
  0x13   : > { %251 = vrot.lane.b32.xlu0 %v1339_v5, %s1236_s27  ;;  %v1269_v33 = vmov 25   ;;  %v1270_v34 = vmov 26   ;;  %v1272_v35 = vmov 29   ;;  %v1273_v36 = vmov 30   ;;  %s1129_s27 = sshll.u32 %s1579_s19, 2 }
  0x14   : > { %v1275_v39 = vmov 33   ;;  %v1390_v42 = vshrl.u32 %v253_v38, 7  ;;  %v1393_v43 = vand.u32 127, %v253_v38  ;;  %v1276_v52 = vmov 34  }
  0x15   : > { %vm1016_vm8 = vcmask 1043456   ;;  %vm1022_vm9 = vcmask 3072   ;;  %vm1031_vm10 = vcmask 11272  }
  0x16   : > { %1189 = vset.pattern.permute.xlu1 %v1237_v6  ;;  %v1396_v44 = vsub.s32 0, %v1390_v42  ;;  %vm255_vm0 = vcmp.lt.s32.totalorder %v1393_v43, 17  ;;  %v1419_v60 = vsub.s32 1, %v1390_v42  ;;  %v1423_v61 = vsub.s32 2, %v1390_v42 }
  0x17   : > { %318 = vperm.xlu1 %1189, %v1320_v0   ;;  %302 = vperm.xlu0 %1188, %v1320_v0   ;;  %vm337_vm1 = vcmp.lt.s32.totalorder %v1393_v43, 16  ;;  %vm418_vm2 = vcmp.lt.s32.totalorder %v1393_v43, 15  ;;  %vm499_vm3 = vcmp.lt.s32.totalorder %v1393_v43, 1  ;;  %vm684_vm4 = vcmp.lt.s32.totalorder %v1393_v43, 127 }
  0x18   : > { %v261_v49 = vrot.slane %v1402_v46, %v1396_v44  ;;  %v265_v50 = vrot.slane %v1407_v47, %v1396_v44  ;;  %vm765_vm5 = vcmp.lt.s32.totalorder %v1393_v43, 113  ;;  %vm846_vm6 = vcmp.lt.s32.totalorder %v1393_v43, 112 }
  0x19   : > { %vm927_vm7 = vcmp.lt.s32.totalorder %v1393_v43, 111 }
  0x1b   : > { %333 = vrot.lane.b32.xlu1 %v1334_v4, %s1238_s28  ;;  %335 = vrot.lane.b32.xlu0 %v1339_v5, %s1238_s28 }
  0x1c   : > { %1190 = vset.pattern.permute.xlu1 %v1239_v7  ;;  %1191 = vset.pattern.permute.xlu0 %v1240_v8 }
  0x1f   : > { %351 = vperm.xlu1 %1190, %v1320_v0   ;;  %367 = vperm.xlu0 %1191, %v1320_v0  }
  0x23   : > { %1192 = vset.pattern.permute.xlu1 %v1241_v9  ;;  %414 = vrot.lane.b32.xlu0 %v1334_v4, %s1242_s29 }
  0x24   : > { %383 = vperm.xlu1 %1192, %v1320_v0   ;;  %1194 = vset.pattern.permute.xlu0 %v1244_v11 }
  0x27   : > { %432 = vperm.xlu0 %1194, %v1320_v0  }
  0x28   : > { %1193 = vset.pattern.permute.xlu1 %v1243_v10 }
  0x29   : > { %399 = vperm.xlu1 %1193, %v1320_v0  }
  0x2b   : > { %1197 = vset.pattern.permute.xlu0 %v1246_v13  ;;  %v1437_v13 = vsub.s32 3, %v1390_v42 }
  0x2c   : > { %480 = vperm.xlu0 %1197, %v1320_v0  }
  0x2d   : > { %416 = vrot.lane.b32.xlu1 %v1339_v5, %s1242_s29  ;;  %s238_s29 = scalar_lea.vmem %s1575_s5, %s1129_s27 }
  0x2e   : > { %1195 = vset.pattern.permute.xlu1 %v1245_v12 }
  0x30   : > { %1198 = vset.pattern.permute.xlu0 %v1247_v14 }
  0x31   : > { %448 = vperm.xlu1 %1195, %v1320_v0   ;;  %513 = vperm.xlu0 %1198, %v1320_v0  }
  0x35   : > { %1196 = vset.pattern.permute.xlu1 %v1248_v15  ;;  %1201 = vset.pattern.permute.xlu0 %v1249_v16 }
  0x36   : > { %464 = vperm.xlu1 %1196, %v1320_v0   ;;  %561 = vperm.xlu0 %1201, %v1320_v0  }
  0x3a   : > { %495 = vrot.lane.b32.xlu1 %v1334_v4, %s1250_s30  ;;  %1204 = vset.pattern.permute.xlu0 %v1252_v18 }
  0x3b   : > { %1199 = vset.pattern.permute.xlu1 %v1251_v17  ;;  %629 = vperm.xlu0 %1204, %v1320_v0  }
  0x3e   : > { %497 = vrot.lane.b32.xlu1 %v1339_v5, %s1250_s30 }
  0x3f   : > { %682 = vrot.lane.b32.xlu0 %v1339_v5, %s1253_s6 }
  0x40   : > { %1207 = vset.pattern.permute.xlu0 %v1254_v19 }
  0x42   : > { %529 = vperm.xlu1 %1199, %v1320_v0  }
  0x43   : > { %714 = vperm.xlu0 %1207, %v1320_v0  }
  0x46   : > { %1200 = vset.pattern.permute.xlu1 %v1255_v20 }
  0x47   : > { %545 = vperm.xlu1 %1200, %v1320_v0   ;;  %761 = vrot.lane.b32.xlu0 %v1334_v4, %s1257_s7 }
  0x48   : > { %1210 = vset.pattern.permute.xlu0 %v1258_v22 }
  0x4b   : > { %1202 = vset.pattern.permute.xlu1 %v1256_v21  ;;  %779 = vperm.xlu0 %1210, %v1320_v0  }
  0x4c   : > { %577 = vperm.xlu1 %1202, %v1320_v0  }
  0x4f   : > { %1213 = vset.pattern.permute.xlu0 %v1260_v24 }
  0x50   : > { %1203 = vset.pattern.permute.xlu1 %v1259_v23  ;;  %827 = vperm.xlu0 %1213, %v1320_v0  }
  0x51   : > { %603 = vperm.xlu1 %1203, %v1320_v0  }
  0x54   : > { %1214 = vset.pattern.permute.xlu0 %v1262_v26 }
  0x55   : > { %1205 = vset.pattern.permute.xlu1 %v1261_v25  ;;  %860 = vperm.xlu0 %1214, %v1320_v0  }
  0x56   : > { %655 = vperm.xlu1 %1205, %v1320_v0  }
  0x59   : > { %1217 = vset.pattern.permute.xlu0 %v1264_v28 }
  0x5a   : > { %680 = vrot.lane.b32.xlu1 %v1334_v4, %s1253_s6  ;;  %908 = vperm.xlu0 %1217, %v1320_v0  }
  0x5b   : > { %1206 = vset.pattern.permute.xlu1 %v1263_v27 }
  0x5e   : > { %698 = vperm.xlu1 %1206, %v1320_v0   ;;  %1218 = vset.pattern.permute.xlu0 %v1266_v30 }
  0x5f   : > { %941 = vperm.xlu0 %1218, %v1320_v0  }
  0x62   : > { %1208 = vset.pattern.permute.xlu1 %v1265_v29 }
  0x63   : > { %730 = vperm.xlu1 %1208, %v1320_v0   ;;  %1221 = vset.pattern.permute.xlu0 %v1268_v32 }
  0x64   : > { %989 = vperm.xlu0 %1221, %v1320_v0  }
  0x67   : > { %1209 = vset.pattern.permute.xlu1 %v1267_v31 }
  0x68   : > { %746 = vperm.xlu1 %1209, %v1320_v0   ;;  %1223 = vset.pattern.permute.xlu0 %v1233_v1 }
  0x6c   : > { %763 = vrot.lane.b32.xlu1 %v1339_v5, %s1257_s7 }
  0x6d   : > { %1211 = vset.pattern.permute.xlu1 %v1269_v33 }
  0x70   : > { %795 = vperm.xlu1 %1211, %v1320_v0  }
  0x74   : > { %1212 = vset.pattern.permute.xlu1 %v1270_v34 }
  0x75   : > { %811 = vperm.xlu1 %1212, %v1320_v0  }
  0x79   : > { %842 = vrot.lane.b32.xlu1 %v1334_v4, %s1271_s8 }
  0x7a   : > { %1215 = vset.pattern.permute.xlu1 %v1272_v35  ;;  %v424_v35 = vrot.slane %v1402_v46, %v1423_v61 }
  0x7d   : > { %844 = vrot.lane.b32.xlu1 %v1339_v5, %s1271_s8 }
  0x81   : > { %876 = vperm.xlu1 %1215, %v1320_v0   ;;  %v250_v40 = vpop.permute.xlu0 %249 }
  0x85   : > { %1216 = vset.pattern.permute.xlu1 %v1273_v36  ;;  %v252_v48 = vpop.permute.xlu0 %251  ;;  %v428_v36 = vrot.slane %v1407_v47, %v1423_v61 }
  0x86   : > { %892 = vperm.xlu1 %1216, %v1320_v0   ;;  %v256_v53 = vsel %vm255_vm0, %v250_v40, %v252_v48  ;;  %v257_v54 = vsel %vm255_vm0, %v252_v48, %v250_v40 }
  0x87   : > { %v266_v57 = vmul.f32 %v261_v49, %v257_v54  ;;  %v267_v58 = vmul.f32 %v265_v50, %v256_v53 }
  0x88   : > { %v271_v37 = vpop.permute.xlu1 %270 }
  0x89   : > { %v276_v63 = vrot.slane %v266_v57, %v1396_v44  ;;  %v292_v2 = vrot.slane %v266_v57, %v1419_v60  ;;  %v296_v3 = vrot.slane %v267_v58, %v1419_v60  ;;  %v308_v9 = vrot.slane %v266_v57, %v1423_v61 }
  0x8a   : > { %923 = vrot.lane.b32.xlu1 %v1334_v4, %s1274_s9  ;;  %v312_v10 = vrot.slane %v267_v58, %v1423_v61  ;;  %v324_v21 = vrot.slane %v266_v57, %v1437_v13  ;;  %v328_v22 = vrot.slane %v267_v58, %v1437_v13 }
  0x8b   : > { %1219 = vset.pattern.permute.xlu1 %v1275_v39  ;;  %v281_v11 = vmul.f32 %v276_v63, %v271_v37 }
  0x8d   : > { %v287_v41 = vpop.permute.xlu1 %286 }
  0x8e   : > { %925 = vrot.lane.b32.xlu1 %v1339_v5, %s1274_s9  ;;  %v343_v5 = vrot.slane %v1402_v46, %v1419_v60  ;;  %v297_v14 = vmul.f32 %v292_v2, %v287_v41  ;;  %v298_v15 = vmul.f32 %v296_v3, %v287_v41 }
  0x90   : > { %v299_v23 = vadd.f32 %v297_v14, %v281_v11 }
  0x92   : > { %v319_v45 = vpop.permute.xlu1 %318  ;;  %957 = vperm.xlu1 %1219, %v1320_v0   ;;  %v303_v55 = vpop.permute.xlu0 %302 }
  0x93   : > { %v313_v19 = vmul.f32 %v308_v9, %v303_v55  ;;  %v314_v20 = vmul.f32 %v312_v10, %v303_v55  ;;  %v329_v31 = vmul.f32 %v324_v21, %v319_v45  ;;  %v330_v32 = vmul.f32 %v328_v22, %v319_v45 }
  0x95   : > { %v315_v28 = vadd.f32 %v313_v19, %v299_v23 }
  0x96   : > { %v334_v51 = vpop.permute.xlu1 %333  ;;  %1220 = vset.pattern.permute.xlu1 %v1276_v52  ;;  %v336_v62 = vpop.permute.xlu0 %335 }
  0x97   : > { %973 = vperm.xlu1 %1220, %v1320_v0   ;;  %v280_v0 = vrot.slane %v267_v58, %v1396_v44  ;;  %v338_v7 = vsel %vm337_vm1, %v334_v51, %v336_v62  ;;  %v339_v8 = vsel %vm337_vm1, %v336_v62, %v334_v51  ;;  %v331_v38 = vadd.f32 %v329_v31, %v315_v28 }
  0x98   : > { %v348_v16 = vmul.f32 %v343_v5, %v339_v8 }
  0x99   : > { %v282_v12 = vmul.f32 %v280_v0, %v271_v37 }
  0x9a   : > { %v352_v59 = vpop.permute.xlu1 %351  ;;  %v357_v25 = vrot.slane %v348_v16, %v1396_v44  ;;  %v368_v30 = vpop.permute.xlu0 %367  ;;  %v373_v40 = vrot.slane %v348_v16, %v1419_v60  ;;  %v389_v52 = vrot.slane %v348_v16, %v1423_v61  ;;  %v405_v63 = vrot.slane %v348_v16, %v1437_v13 }
  0x9b   : > { %1222 = vset.pattern.permute.xlu1 %v1233_v1  ;;  %v347_v1 = vrot.slane %v1407_v47, %v1419_v60  ;;  %v300_v24 = vadd.f32 %v298_v15, %v282_v12  ;;  %v505_v16 = vrot.slane %v1402_v46, %v1437_v13 }
  0x9c   : > { %1006 = vperm.xlu1 %1222, %v245_v56   ;;  %v362_v33 = vmul.f32 %v357_v25, %v352_v59  ;;  %v378_v54 = vmul.f32 %v373_v40, %v368_v30 }
  0x9d   : > { %v349_v17 = vmul.f32 %v347_v1, %v338_v7  ;;  %v316_v29 = vadd.f32 %v314_v20, %v300_v24 }
  0x9e   : > { %v415_v48 = vpop.permute.xlu0 %414  ;;  %v364_v51 = vadd.f32 %v362_v33, %v331_v38 }
  0x9f   : > { %v384_v6 = vpop.permute.xlu1 %383  ;;  %v361_v26 = vrot.slane %v349_v17, %v1396_v44  ;;  %v332_v39 = vadd.f32 %v330_v32, %v316_v29  ;;  %v377_v41 = vrot.slane %v349_v17, %v1419_v60  ;;  %v393_v53 = vrot.slane %v349_v17, %v1423_v61 }
  0xa0   : > { %v409_v0 = vrot.slane %v349_v17, %v1437_v13  ;;  %v394_v2 = vmul.f32 %v389_v52, %v384_v6 }
  0xa1   : > { %v363_v34 = vmul.f32 %v361_v26, %v352_v59  ;;  %v379_v55 = vmul.f32 %v377_v41, %v368_v30  ;;  %v380_v59 = vadd.f32 %v378_v54, %v364_v51  ;;  %v395_v3 = vmul.f32 %v393_v53, %v384_v6 }
  0xa2   : > { %v433_v12 = vpop.permute.xlu0 %432  ;;  %v509_v6 = vrot.slane %v1407_v47, %v1437_v13 }
  0xa3   : > { %v365_v45 = vadd.f32 %v363_v34, %v332_v39  ;;  %v396_v8 = vadd.f32 %v394_v2, %v380_v59  ;;  %v612_v2 = vsub.s32 5, %v1390_v42 }
  0xa4   : > { %v400_v18 = vpop.permute.xlu1 %399 }
  0xa5   : > { %v381_v62 = vadd.f32 %v379_v55, %v365_v45  ;;  %v410_v10 = vmul.f32 %v405_v63, %v400_v18  ;;  %v411_v11 = vmul.f32 %v409_v0, %v400_v18 }
  0xa7   : > { %v397_v9 = vadd.f32 %v395_v3, %v381_v62  ;;  %v412_v17 = vadd.f32 %v410_v10, %v396_v8  ;;  %v481_v38 = vpop.permute.xlu0 %480  ;;  %v583_v10 = vrot.slane %v1334_v4, %v1396_v44 }
  0xa8   : > { %v417_v27 = vpop.permute.xlu1 %416 }
  0xa9   : > { %v419_v49 = vsel %vm418_vm2, %v415_v48, %v417_v27  ;;  %v420_v50 = vsel %vm418_vm2, %v417_v27, %v415_v48  ;;  %v413_v20 = vadd.f32 %v411_v11, %v397_v9 }
  0xaa   : > { %v429_v56 = vmul.f32 %v424_v35, %v420_v50  ;;  %v430_v57 = vmul.f32 %v428_v36, %v419_v49 }
  0xac   : > { %v449_v37 = vpop.permute.xlu1 %448  ;;  %v438_v5 = vrot.slane %v429_v56, %v1396_v44  ;;  %v442_v1 = vrot.slane %v430_v57, %v1396_v44  ;;  %v454_v21 = vrot.slane %v429_v56, %v1419_v60  ;;  %v458_v22 = vrot.slane %v430_v57, %v1419_v60  ;;  %v514_v45 = vpop.permute.xlu0 %513 }
  0xad   : > { %v470_v27 = vrot.slane %v429_v56, %v1423_v61  ;;  %v474_v28 = vrot.slane %v430_v57, %v1423_v61  ;;  %v486_v40 = vrot.slane %v429_v56, %v1437_v13  ;;  %v490_v41 = vrot.slane %v430_v57, %v1437_v13 }
  0xae   : > { %v443_v14 = vmul.f32 %v438_v5, %v433_v12  ;;  %v444_v15 = vmul.f32 %v442_v1, %v433_v12  ;;  %v459_v29 = vmul.f32 %v454_v21, %v449_v37  ;;  %v460_v30 = vmul.f32 %v458_v22, %v449_v37 }
  0xaf   : > { %v491_v37 = vmul.f32 %v486_v40, %v481_v38  ;;  %v492_v52 = vmul.f32 %v490_v41, %v481_v38  ;;  %v586_v57 = vsub.s32 4, %v1390_v42  ;;  %v1484_v21 = vsub.s32 6, %v1390_v42 }
  0xb0   : > { %v445_v24 = vadd.f32 %v443_v14, %v412_v17  ;;  %v446_v25 = vadd.f32 %v444_v15, %v413_v20  ;;  %v694_v38 = vrot.slane %v1407_v47, %v612_v2 }
  0xb1   : > { %v465_v58 = vpop.permute.xlu1 %464  ;;  %v587_v11 = vrot.slane %v1334_v4, %v586_v57 }
  0xb2   : > { %v461_v33 = vadd.f32 %v459_v29, %v445_v24  ;;  %v462_v34 = vadd.f32 %v460_v30, %v446_v25  ;;  %v475_v35 = vmul.f32 %v470_v27, %v465_v58  ;;  %v476_v36 = vmul.f32 %v474_v28, %v465_v58 }
  0xb3   : > { %v593_v25 = vrot.slane %v583_v10, %v1396_v44  ;;  %v635_v29 = vrot.slane %v1334_v4, %v1423_v61  ;;  %v1493_v30 = vsub.s32 7, %v1390_v42  ;;  %v661_v42 = vrot.slane %v1334_v4, %v1437_v13 }
  0xb4   : > { %v477_v50 = vadd.f32 %v475_v35, %v461_v33  ;;  %v478_v51 = vadd.f32 %v476_v36, %v462_v34  ;;  %v639_v33 = vrot.slane %v1334_v4, %v1484_v21  ;;  %v690_v36 = vrot.slane %v1402_v46, %v612_v2 }
  0xb5   : > { %v496_v7 = vpop.permute.xlu1 %495 }
  0xb6   : > { %v493_v59 = vadd.f32 %v491_v37, %v477_v50  ;;  %v494_v58 = vadd.f32 %v492_v52, %v478_v51  ;;  %v645_v52 = vrot.slane %v635_v29, %v1423_v61 }
  0xb9   : > { %v498_v19 = vpop.permute.xlu1 %497 }
  0xba   : > { %v500_v23 = vsel %vm499_vm3, %v496_v7, %v498_v19  ;;  %v501_v18 = vsel %vm499_vm3, %v498_v19, %v496_v7  ;;  %v562_v7 = vpop.permute.xlu0 %561 }
  0xbb   : > { %v510_v31 = vmul.f32 %v505_v16, %v501_v18  ;;  %v511_v32 = vmul.f32 %v509_v6, %v500_v23  ;;  %v609_v16 = vrot.slane %v1334_v4, %v1419_v60  ;;  %v613_v6 = vrot.slane %v1334_v4, %v612_v2 }
  0xbd   : > { %v530_v26 = vpop.permute.xlu1 %529  ;;  %v519_v48 = vrot.slane %v510_v31, %v1396_v44  ;;  %v523_v49 = vrot.slane %v511_v32, %v1396_v44  ;;  %v535_v62 = vrot.slane %v510_v31, %v1419_v60  ;;  %v539_v56 = vrot.slane %v511_v32, %v1419_v60 }
  0xbe   : > { %v551_v8 = vrot.slane %v510_v31, %v1423_v61  ;;  %v555_v9 = vrot.slane %v511_v32, %v1423_v61  ;;  %v567_v17 = vrot.slane %v510_v31, %v1437_v13  ;;  %v571_v20 = vrot.slane %v511_v32, %v1437_v13  ;;  %v630_v22 = vpop.permute.xlu0 %629 }
  0xbf   : > { %v524_v53 = vmul.f32 %v519_v48, %v514_v45  ;;  %v525_v54 = vmul.f32 %v523_v49, %v514_v45  ;;  %v540_v5 = vmul.f32 %v535_v62, %v530_v26  ;;  %v541_v1 = vmul.f32 %v539_v56, %v530_v26 }
  0xc0   : > { %v597_v26 = vrot.slane %v587_v11, %v1396_v44  ;;  %v619_v27 = vrot.slane %v609_v16, %v1419_v60  ;;  %v623_v28 = vrot.slane %v613_v6, %v1419_v60  ;;  %v572_v31 = vmul.f32 %v567_v17, %v562_v7 }
  0xc1   : > { %v526_v63 = vadd.f32 %v524_v53, %v493_v59  ;;  %v527_v0 = vadd.f32 %v525_v54, %v494_v58  ;;  %v573_v32 = vmul.f32 %v571_v20, %v562_v7  ;;  %v665_v49 = vrot.slane %v1334_v4, %v1493_v30 }
  0xc2   : > { %v546_v39 = vpop.permute.xlu1 %545  ;;  %v683_v35 = vpop.permute.xlu0 %682  ;;  %v649_v53 = vrot.slane %v639_v33, %v1423_v61  ;;  %v650_v4 = vmul.f32 %v645_v52, %v630_v22  ;;  %v775_v16 = vrot.slane %v1407_v47, %v1484_v21 }
  0xc3   : > { %v542_v12 = vadd.f32 %v540_v5, %v526_v63  ;;  %v543_v14 = vadd.f32 %v541_v1, %v527_v0  ;;  %v556_v15 = vmul.f32 %v551_v8, %v546_v39  ;;  %v557_v19 = vmul.f32 %v555_v9, %v546_v39 }
  0xc4   : > { %v675_v57 = vrot.slane %v665_v49, %v1437_v13  ;;  %v651_v2 = vmul.f32 %v649_v53, %v630_v22 }
  0xc5   : > { %v558_v18 = vadd.f32 %v556_v15, %v542_v12  ;;  %v559_v24 = vadd.f32 %v557_v19, %v543_v14  ;;  %v771_v19 = vrot.slane %v1402_v46, %v1484_v21 }
  0xc6   : > { %v715_v14 = vpop.permute.xlu0 %714 }
  0xc7   : > { %v578_v55 = vpop.permute.xlu1 %577  ;;  %v574_v39 = vadd.f32 %v572_v31, %v558_v18  ;;  %v575_v40 = vadd.f32 %v573_v32, %v559_v24 }
  0xc8   : > { %v598_v41 = vmul.f32 %v593_v25, %v578_v55  ;;  %v599_v48 = vmul.f32 %v597_v26, %v578_v55  ;;  %v671_v55 = vrot.slane %v661_v42, %v1437_v13 }
  0xca   : > { %v600_v59 = vadd.f32 %v598_v41, %v574_v39  ;;  %v601_v58 = vadd.f32 %v599_v48, %v575_v40  ;;  %v762_v24 = vpop.permute.xlu0 %761 }
  0xcc   : > { %v604_v3 = vpop.permute.xlu1 %603 }
  0xcd   : > { %v624_v45 = vmul.f32 %v619_v27, %v604_v3  ;;  %v625_v37 = vmul.f32 %v623_v28, %v604_v3 }
  0xcf   : > { %v626_v63 = vadd.f32 %v624_v45, %v600_v59  ;;  %v627_v0 = vadd.f32 %v625_v37, %v601_v58 }
  0xd1   : > { %v656_v23 = vpop.permute.xlu1 %655  ;;  %v652_v7 = vadd.f32 %v650_v4, %v626_v63  ;;  %v653_v8 = vadd.f32 %v651_v2, %v627_v0  ;;  %v852_v2 = vrot.slane %v1402_v46, %v1493_v30 }
  0xd2   : > { %v676_v9 = vmul.f32 %v671_v55, %v656_v23  ;;  %v677_v10 = vmul.f32 %v675_v57, %v656_v23 }
  0xd4   : > { %v678_v6 = vadd.f32 %v676_v9, %v652_v7  ;;  %v679_v17 = vadd.f32 %v677_v10, %v653_v8 }
  0xd5   : > { %v681_v34 = vpop.permute.xlu1 %680 }
  0xd6   : > { %v685_v50 = vsel %vm684_vm4, %v681_v34, %v683_v35  ;;  %v686_v51 = vsel %vm684_vm4, %v683_v35, %v681_v34 }
  0xd7   : > { %v695_v62 = vmul.f32 %v690_v36, %v685_v50  ;;  %v696_v56 = vmul.f32 %v694_v38, %v686_v51  ;;  %v780_v51 = vpop.permute.xlu0 %779 }
  0xd9   : > { %v699_v54 = vpop.permute.xlu1 %698  ;;  %v704_v3 = vrot.slane %v695_v62, %v1396_v44  ;;  %v708_v1 = vrot.slane %v696_v56, %v1396_v44  ;;  %v720_v20 = vrot.slane %v695_v62, %v1419_v60  ;;  %v724_v22 = vrot.slane %v696_v56, %v1419_v60 }
  0xda   : > { %v736_v33 = vrot.slane %v695_v62, %v1423_v61  ;;  %v740_v21 = vrot.slane %v696_v56, %v1423_v61  ;;  %v752_v36 = vrot.slane %v695_v62, %v1437_v13  ;;  %v756_v38 = vrot.slane %v696_v56, %v1437_v13 }
  0xdb   : > { %v709_v11 = vmul.f32 %v704_v3, %v699_v54  ;;  %v710_v12 = vmul.f32 %v708_v1, %v699_v54  ;;  %v725_v28 = vmul.f32 %v720_v20, %v715_v14  ;;  %v726_v29 = vmul.f32 %v724_v22, %v715_v14 }
  0xdd   : > { %v711_v18 = vadd.f32 %v709_v11, %v678_v6  ;;  %v712_v23 = vadd.f32 %v710_v12, %v679_v17 }
  0xde   : > { %v731_v5 = vpop.permute.xlu1 %730 }
  0xdf   : > { %v727_v34 = vadd.f32 %v725_v28, %v711_v18  ;;  %v728_v35 = vadd.f32 %v726_v29, %v712_v23  ;;  %v741_v40 = vmul.f32 %v736_v33, %v731_v5  ;;  %v742_v41 = vmul.f32 %v740_v21, %v731_v5 }
  0xe0   : > { %v856_v5 = vrot.slane %v1407_v47, %v1493_v30 }
  0xe1   : > { %v743_v45 = vadd.f32 %v741_v40, %v727_v34  ;;  %v744_v37 = vadd.f32 %v742_v41, %v728_v35 }
  0xe3   : > { %v747_v15 = vpop.permute.xlu1 %746 }
  0xe4   : > { %v757_v49 = vmul.f32 %v752_v36, %v747_v15  ;;  %v758_v50 = vmul.f32 %v756_v38, %v747_v15  ;;  %v828_v15 = vpop.permute.xlu0 %827 }
  0xe6   : > { %v759_v59 = vadd.f32 %v757_v49, %v743_v45  ;;  %v760_v58 = vadd.f32 %v758_v50, %v744_v37  ;;  %v1130_v45 = vld [vmem:[%s1571_s1 + $0x10] ss:$0 sm:$0xff]  ;;  %v1131_v37 = vld [vmem:[%s1571_s1 + $0x18] ss:$0 sm:$0xff] }
  0xe7   : > { %v764_v25 = vpop.permute.xlu1 %763 }
  0xe8   : > { %v766_v26 = vsel %vm765_vm5, %v762_v24, %v764_v25  ;;  %v767_v27 = vsel %vm765_vm5, %v764_v25, %v762_v24  ;;  %v861_v18 = vpop.permute.xlu0 %860 }
  0xe9   : > { %v776_v31 = vmul.f32 %v771_v19, %v766_v26  ;;  %v777_v32 = vmul.f32 %v775_v16, %v767_v27 }
  0xeb   : > { %v796_v39 = vpop.permute.xlu1 %795  ;;  %v785_v48 = vrot.slane %v776_v31, %v1396_v44  ;;  %v789_v42 = vrot.slane %v777_v32, %v1396_v44  ;;  %v801_v62 = vrot.slane %v776_v31, %v1419_v60  ;;  %v805_v56 = vrot.slane %v777_v32, %v1419_v60 }
  0xec   : > { %v817_v3 = vrot.slane %v776_v31, %v1423_v61  ;;  %v821_v1 = vrot.slane %v777_v32, %v1423_v61  ;;  %v833_v6 = vrot.slane %v776_v31, %v1437_v13  ;;  %v837_v46 = vrot.slane %v777_v32, %v1437_v13 }
  0xed   : > { %v790_v52 = vmul.f32 %v785_v48, %v780_v51  ;;  %v791_v53 = vmul.f32 %v789_v42, %v780_v51  ;;  %v806_v0 = vmul.f32 %v801_v62, %v796_v39  ;;  %v807_v4 = vmul.f32 %v805_v56, %v796_v39  ;;  %v909_v51 = vpop.permute.xlu0 %908 }
  0xee   : > { %v838_v23 = vmul.f32 %v833_v6, %v828_v15  ;;  %v839_v24 = vmul.f32 %v837_v46, %v828_v15 }
  0xef   : > { %v792_v55 = vadd.f32 %v790_v52, %v759_v59  ;;  %v793_v57 = vadd.f32 %v791_v53, %v760_v58 }
  0xf0   : > { %v812_v54 = vpop.permute.xlu1 %811 }
  0xf1   : > { %v808_v7 = vadd.f32 %v806_v0, %v792_v55  ;;  %v809_v8 = vadd.f32 %v807_v4, %v793_v57  ;;  %v822_v10 = vmul.f32 %v817_v3, %v812_v54  ;;  %v823_v11 = vmul.f32 %v821_v1, %v812_v54  ;;  %v942_v57 = vpop.permute.xlu0 %941 }
  0xf3   : > { %v824_v20 = vadd.f32 %v822_v10, %v808_v7  ;;  %v825_v22 = vadd.f32 %v823_v11, %v809_v8 }
  0xf4   : > { %v843_v63 = vpop.permute.xlu1 %842 }
  0xf5   : > { %v840_v27 = vadd.f32 %v838_v23, %v824_v20  ;;  %v841_v28 = vadd.f32 %v839_v24, %v825_v22 }
  0xf8   : > { %v845_v9 = vpop.permute.xlu1 %844 }
  0xf9   : > { %v847_v12 = vsel %vm846_vm6, %v843_v63, %v845_v9  ;;  %v848_v14 = vsel %vm846_vm6, %v845_v9, %v843_v63 }
  0xfa   : > { %v857_v19 = vmul.f32 %v852_v2, %v847_v12  ;;  %v858_v16 = vmul.f32 %v856_v5, %v848_v14 }
  0xfc   : > { %v866_v47 = vrot.slane %v857_v19, %v1396_v44  ;;  %v870_v30 = vrot.slane %v858_v16, %v1396_v44  ;;  %v877_v17 = vpop.permute.xlu1 %876  ;;  %v882_v29 = vrot.slane %v857_v19, %v1419_v60  ;;  %v886_v31 = vrot.slane %v858_v16, %v1419_v60 }
  0xfd   : > { %v898_v36 = vrot.slane %v857_v19, %v1423_v61  ;;  %v902_v38 = vrot.slane %v858_v16, %v1423_v61  ;;  %v914_v49 = vrot.slane %v857_v19, %v1437_v13  ;;  %v918_v50 = vrot.slane %v858_v16, %v1437_v13  ;;  %v990_v16 = vpop.permute.xlu0 %989 }
  0xfe   : > { %v871_v25 = vmul.f32 %v866_v47, %v861_v18  ;;  %v872_v26 = vmul.f32 %v870_v30, %v861_v18  ;;  %v887_v34 = vmul.f32 %v882_v29, %v877_v17  ;;  %v888_v35 = vmul.f32 %v886_v31, %v877_v17 }
  0xff   : > { %v919_v56 = vmul.f32 %v914_v49, %v909_v51  ;;  %v920_v55 = vmul.f32 %v918_v50, %v909_v51 }
 0x100   : > { %v873_v32 = vadd.f32 %v871_v25, %v840_v27  ;;  %v874_v21 = vadd.f32 %v872_v26, %v841_v28 }
 0x101   : > { %v893_v33 = vpop.permute.xlu1 %892 }
 0x102   : > { %v889_v40 = vadd.f32 %v887_v34, %v873_v32  ;;  %v890_v41 = vadd.f32 %v888_v35, %v874_v21  ;;  %v903_v48 = vmul.f32 %v898_v36, %v893_v33  ;;  %v904_v42 = vmul.f32 %v902_v38, %v893_v33 }
 0x104   : > { %v905_v54 = vadd.f32 %v903_v48, %v889_v40  ;;  %v906_v59 = vadd.f32 %v904_v42, %v890_v41 }
 0x105   : > { %v924_v39 = vpop.permute.xlu1 %923 }
 0x106   : > { %v921_v3 = vadd.f32 %v919_v56, %v905_v54  ;;  %v922_v1 = vadd.f32 %v920_v55, %v906_v59 }
 0x109   : > { %v926_v52 = vpop.permute.xlu1 %925 }
 0x10a   : > { %v928_v53 = vsel %vm927_vm7, %v924_v39, %v926_v52  ;;  %v929_v43 = vsel %vm927_vm7, %v926_v52, %v924_v39 }
 0x10b   : > { %v938_v58 = vmul.f32 %v1130_v45, %v928_v53  ;;  %v939_v62 = vmul.f32 %v1131_v37, %v929_v43 }
 0x10d   : > { %v947_v63 = vrot.slane %v938_v58, %v1396_v44  ;;  %v951_v0 = vrot.slane %v939_v62, %v1396_v44  ;;  %v963_v4 = vrot.slane %v938_v58, %v1419_v60  ;;  %v967_v2 = vrot.slane %v939_v62, %v1419_v60  ;;  %v958_v5 = vpop.permute.xlu1 %957 }
 0x10e   : > { %v995_v9 = vrot.slane %v938_v58, %v1437_v13  ;;  %v999_v10 = vrot.slane %v939_v62, %v1437_v13  ;;  %v979_v11 = vrot.slane %v938_v58, %v1423_v61  ;;  %v983_v12 = vrot.slane %v939_v62, %v1423_v61 }
 0x10f   : > { %v952_v7 = vmul.f32 %v947_v63, %v942_v57  ;;  %v953_v8 = vmul.f32 %v951_v0, %v942_v57  ;;  %v968_v44 = vmul.f32 %v963_v4, %v958_v5  ;;  %v969_v19 = vmul.f32 %v967_v2, %v958_v5 }
 0x110   : > { %v1000_v17 = vmul.f32 %v995_v9, %v990_v16  ;;  %v1001_v20 = vmul.f32 %v999_v10, %v990_v16 }
 0x111   : > { %v954_v14 = vadd.f32 %v952_v7, %v921_v3  ;;  %v955_v15 = vadd.f32 %v953_v8, %v922_v1 }
 0x112   : > { %v974_v60 = vpop.permute.xlu1 %973 }
 0x113   : > { %v970_v6 = vadd.f32 %v968_v44, %v954_v14  ;;  %v971_v46 = vadd.f32 %v969_v19, %v955_v15  ;;  %v984_v47 = vmul.f32 %v979_v11, %v974_v60  ;;  %v985_v30 = vmul.f32 %v983_v12, %v974_v60 }
 0x115   : > { %v986_v22 = vadd.f32 %v984_v47, %v970_v6  ;;  %v987_v18 = vadd.f32 %v985_v30, %v971_v46 }
 0x117   : > { %v1007_v13 = vpop.permute.xlu1 %1006  ;;  %v1002_v23 = vadd.f32 %v1000_v17, %v986_v22  ;;  %v1003_v24 = vadd.f32 %v1001_v20, %v987_v18 }
 0x119   : > { %v1009_v61 = vadd.f32 %v1007_v13, %v1002_v23  ;;  %v1010_v25 = vadd.f32 %v1007_v13, %v1003_v24 }
 0x11b   : > { %v1013_v26 = vcombine.low %v1009_v61, %v1010_v25  ;;  %v1017_v27 = vsel %vm1016_vm8, %v1009_v61, 0.0  ;;  %v1018_v28 = vsel %vm1016_vm8, %v1010_v25, 0.0  ;;  %v1024_v29 = vmul.f32 %v1009_v61, %v1009_v61 }
 0x11c   : > { %v1019_v31 = vadd.f32 %v1018_v28, %v1017_v27  ;;  %v1025_v33 = vmul.f32 %v1010_v25, %v1010_v25 }
 0x11d   : > { %1015 = vst [vmem:[%s233_s26] sm:$0xff] %v1013_v26  ;;  %v1026_v32 = vsel %vm1016_vm8, %v1024_v29, 0.0 }
 0x11e   : > { %1020 = vadd.xlane.f32.xlu1 %v1019_v31  ;;  %v1027_v21 = vsel %vm1016_vm8, %v1025_v33, 0.0 }
 0x11f   : > { %v1028_v34 = vadd.f32 %v1027_v21, %v1026_v32 }
 0x121   : > { %1029 = vadd.xlane.f32.xlu0 %v1028_v34 }
 0x1a7   : > { %v1021_v35 = vpop.xlane.xlu1 %1020 }
 0x1a8   : > { %1023 = vst.msk [vmem:[%s238_s29] sm:$0xf] %vm1022_vm9, %v1021_v35 }
 0x1aa   : > { %v1030_v36 = vpop.xlane.xlu0 %1029 }
 0x1ab   : > { %1032 = vst.msk [vmem:[%s238_s29] sm:$0xf] %vm1031_vm10, %v1030_v36 }
 0x1ac PF: > { %s16_s18 = sadd.s32 1, %s1231_s18  }
 0x1ad   : > { %p13_p5 = scmp.ge.s32.totalorder %s16_s18, 4  }
 0x1af   :  { %15 = sbr.rel (!%p13_p5) target bundleno = 1 (0x1), region = 78 }

// kernel: residual_block.4
= control target key start
LH: loop header
LB: loop body
LE: loop exit
PB: predicated region body
PF: predicated region fallthrough
CT: control target
= control target key end

     0   :  { %s1508_s11 = smov 0   ;;  %s1959_s0 = inlined_call_operand.vmem [shape: f32[4,512], index: 0, kind: input, shape index: {}]   ;;  %s1960_s1 = inlined_call_operand.vmem [shape: f32[2,4,2], index: 1, kind: input, shape index: {}]   ;;  %s1961_s2 = inlined_call_operand.vmem [shape: f32[4,1], index: 2, kind: input, shape index: {}]   ;;  %s1962_s3 = inlined_call_operand.vmem [shape: f32[4,1], index: 3, kind: input, shape index: {}]   ;;  %s1963_s4 = inlined_call_operand.<no memory space> [shape: f32[1,1], index: 4, kind: input, shape index: {}]   ;;  %s1964_s5 = inlined_call_operand.vmem [shape: f32[9,256], index: 5, kind: input, shape index: {}]   ;;  %s1965_s6 = inlined_call_operand.vmem [shape: f32[4,36], index: 6, kind: input, shape index: {}]   ;;  %s1966_s7 = inlined_call_operand.vmem [shape: f32[4,1], index: 7, kind: input, shape index: {}]   ;;  %s1967_s8 = inlined_call_operand.vmem [shape: f32[4,512], index: 8, kind: output, shape index: {0}]   ;;  %s1968_s9 = inlined_call_operand.vmem [shape: f32[2,4,2], index: 9, kind: output, shape index: {1}]  }
   0x1   :  { %v15_v0 = vstv %s1963_s4 }
   0x2   :  { %16 = vst [vmem:[#allocation2] sm:$0x1] %v15_v0 }
   0x3 LB: > { %s1514_s12 = sadd.s32 4294967295, %s1408_s11   ;;  %p1297_p0 = scmp.ge.s32.totalorder %s1408_s11, 1  ;;  %s1408_s11 = sphi %s1508_s11, %s22_s11  }
   0x4   : > { %p293_p1 = scmp.lt.s32.totalorder %s1408_s11, 3 }
   0x6   : > { %p294_p2 = pnand %p1297_p0, %p293_p1 }
   0x7   : > { %s1410_s16 = smov (!%p294_p2), 1   ;;  %s1412_s17 = smov (!%p294_p2), 127  }
   0x8   : > { %297 = sbr.rel (%p294_p2) target bundleno = 775 (0x307), region = 52  ;;  %s1298_s24 = sshll.u32 (!%p294_p2), %s1514_s12, 1 }
   0x9   : > { %p334_p3 = scmp.lt.s32.totalorder (!%p294_p2), %s1298_s24, 3  ;;  %s1433_s29 = smov (!%p294_p2), 15  }
   0xa   : > { %s1434_s30 = smov (!%p294_p2), 17   ;;  %s1435_s10 = smov (!%p294_p2), 16  }
   0xb   : > { %s1437_s13 = smov (!%p294_p2), 113   ;;  %s1449_s14 = smov (!%p294_p2), 112  }
   0xc   : > { %s1453_s4 = smov (!%p294_p2), 111   ;;  %p345_p4 = scmp.lt.s32.totalorder (!%p294_p2), %s1514_s12, 1 }
   0xd   : > { %v349_v1 = vld [vmem:[%s1960_s1] sm:$0xf]  ;;  %v350_v2 = vld [vmem:[%s1960_s1 + $0x4] sm:$0xf]  ;;  %vm353_vm0 = vcmask 11264   ;;  %v1411_v11 = vmov 0   ;;  %v381_v42 = vlaneseq }
   0xe   : > { %v354_v3 = vsel %vm353_vm0, %v349_v1, 0.0  ;;  %v355_v4 = vsel %vm353_vm0, %v350_v2, 0.0  ;;  %1361 = vset.pattern.permute.xlu1 %v1411_v11  ;;  %1362 = vset.pattern.permute.xlu0 %v1411_v11  ;;  %v1303_v13 = vld [vmem:[#allocation2] ss:$0 sm:$0xff]  ;;  %v1413_v15 = vmov 2   ;;  %v1414_v16 = vmov 5  }
   0xf   : > { %v356_v5 = vadd.f32 %v355_v4, %v354_v3  ;;  %v1531_v14 = vld [vmem:[%s1965_s6] sm:$0xf]  ;;  %v1415_v17 = vmov 8   ;;  %v1416_v18 = vmov 11   ;;  %v1417_v19 = vmov 12   ;;  %s1970_s24 = smov (!%p334_p3, %s1298_s24), 3 }
  0x10   : > { %v1418_v20 = vmov 15   ;;  %v351_v21 = vld [vmem:[%s1961_s2] sm:$0xf]  ;;  %v1419_v27 = vmov 1   ;;  %v1420_v28 = vmov 18   ;;  %v1421_v29 = vmov 3  }
  0x11   : > { %v357_v6 = vmul.f32 0.001953125, %v356_v5  ;;  %v352_v24 = vld [vmem:[%s1962_s3] sm:$0xf]  ;;  %v1422_v30 = vmov 4   ;;  %v1423_v31 = vmov 6   ;;  %v1424_v32 = vmov 7  }
  0x12   : > { %v1425_v33 = vmov 9   ;;  %v1426_v34 = vmov 10   ;;  %v1427_v35 = vmov 13   ;;  %v1428_v36 = vmov 14   ;;  %s1299_s25 = sshll.u32 %s1970_s24, 2  ;;  %s1972_s12 = smov (!%p345_p4, %s1514_s12), 1 }
  0x13   : > { %v358_v7 = vmul.f32 %v357_v6, %v357_v6  ;;  %v1429_v37 = vmov 16   ;;  %v1430_v38 = vmov 17   ;;  %v1431_v39 = vmov 19   ;;  %s337_s28 = scalar_lea.vmem %s1959_s0, %s1299_s25 }
  0x14   : > { %v1432_v40 = vmov 839922192   ;;  %v1561_v44 = vshrl.u32 %v381_v42, 7  ;;  %v373_v48 = vld [vmem:[%s337_s28] sm:$0xff]  ;;  %v1436_v57 = vmov 21   ;;  %v1438_v58 = vmov 24  }
  0x15   : > { %360 = vrot.lane.b32.xlu0 %v358_v7, %s1410_s16  ;;  %v379_v41 = vunpack.c.l.s4 %v1432_v40  ;;  %v1439_v59 = vmov 20   ;;  %v1440_v60 = vmov 27   ;;  %v1441_v61 = vmov 22  }
  0x16   : > { %v1442_v62 = vmov 28   ;;  %v1443_v63 = vmov 23   ;;  %v1444_v0 = vmov 31   ;;  %v1445_v1 = vmov 25  }
  0x17   : > { %v380_v43 = vunpack.c.0.s8 %v379_v41  ;;  %v1446_v2 = vmov 32   ;;  %v1447_v3 = vmov 35   ;;  %v1448_v4 = vmov 26  }
  0x18   : > { %vm1189_vm10 = vcmask 1043456   ;;  %vm1195_vm11 = vcmask 3072   ;;  %vm1204_vm12 = vcmask 11272  }
  0x19   : > { %v383_v45 = vsub.s32 %v380_v43, %v1561_v44 }
  0x87   : > { %v361_v8 = vpop.permute.xlu0 %360 }
  0x88   : > { %v363_v9 = vsub.f32 %v357_v6, %v361_v8 }
  0x8a   : > { %v364_v10 = vadd.f32 1e-05, %v363_v9  ;;  %v1451_v9 = vmov 30  }
  0x8c   : > { %1400 = vrsqrt.f32 %v364_v10 }
  0x99   : > { %v1401_v12 = vpop.eup %1400 }
  0x9a   : > { %367 = vrot.lane.b32.xlu0 %v1401_v12, %s1412_s17  ;;  %v1452_v12 = vmov 33  }
  0x9e   : > { %408 = vperm.xlu0 %1362, %v1303_v13  }
  0xa2   : > { %443 = vperm.xlu0 %1362, %v1531_v14  }
  0xa6   : > { %1364 = vset.pattern.permute.xlu0 %v1413_v15 }
  0xa7   : > { %475 = vperm.xlu0 %1364, %v1531_v14  }
  0xab   : > { %1367 = vset.pattern.permute.xlu0 %v1414_v16 }
  0xac   : > { %540 = vperm.xlu0 %1367, %v1531_v14  }
  0xb0   : > { %1370 = vset.pattern.permute.xlu0 %v1415_v17 }
  0xb1   : > { %605 = vperm.xlu0 %1370, %v1531_v14  }
  0xb5   : > { %1373 = vset.pattern.permute.xlu0 %v1416_v18  ;;  %v1454_v18 = vmov 34  }
  0xb6   : > { %653 = vperm.xlu0 %1373, %v1531_v14  }
  0xba   : > { %1374 = vset.pattern.permute.xlu0 %v1417_v19 }
  0xbb   : > { %686 = vperm.xlu0 %1374, %v1531_v14  }
  0xbf   : > { %1377 = vset.pattern.permute.xlu0 %v1418_v20 }
  0xc0   : > { %734 = vperm.xlu0 %1377, %v1531_v14  }
  0xc4   : > { %1380 = vset.pattern.permute.xlu0 %v1420_v28 }
 0x10c   : > { %v368_v22 = vpop.permute.xlu0 %367 }
 0x10d   : > { %v370_v23 = vmul.f32 %v368_v22, %v351_v21  ;;  %v418_v21 = vld [vmem:[%s1966_s7] sm:$0xf] }
 0x10f   : > { %v371_v25 = vmul.f32 %v370_v23, %v357_v6  ;;  %376 = vperm.xlu1 %1361, %v370_v23   ;;  %v1450_v6 = vmov 29  }
 0x111   : > { %v372_v26 = vsub.f32 %v352_v24, %v371_v25 }
 0x113   : > { %389 = vperm.xlu1 %1361, %v372_v26  }
 0x117   : > { %1363 = vset.pattern.permute.xlu1 %v1419_v27 }
 0x118   : > { %459 = vperm.xlu1 %1363, %v1531_v14  }
 0x119   : > { %v409_v53 = vpop.permute.xlu0 %408 }
 0x11c   : > { %1365 = vset.pattern.permute.xlu1 %v1421_v29 }
 0x11d   : > { %491 = vperm.xlu1 %1365, %v1531_v14   ;;  %v444_v15 = vpop.permute.xlu0 %443 }
 0x121   : > { %1366 = vset.pattern.permute.xlu1 %v1422_v30 }
 0x122   : > { %524 = vperm.xlu1 %1366, %v1531_v14   ;;  %v476_v17 = vpop.permute.xlu0 %475 }
 0x126   : > { %1368 = vset.pattern.permute.xlu1 %v1423_v31  ;;  %v1658_v31 = vand.u32 127, %v381_v42 }
 0x127   : > { %556 = vperm.xlu1 %1368, %v1531_v14   ;;  %v1633_v20 = vpop.permute.xlu0 %540 }
 0x128   : > { %vm510_vm2 = vcmp.lt.s32.totalorder %v1658_v31, 16  ;;  %vm428_vm3 = vcmp.lt.s32.totalorder %v1658_v31, 17  ;;  %vm591_vm4 = vcmp.lt.s32.totalorder %v1658_v31, 15  ;;  %vm672_vm5 = vcmp.lt.s32.totalorder %v1658_v31, 1 }
 0x129   : > { %vm857_vm6 = vcmp.lt.s32.totalorder %v1658_v31, 127  ;;  %vm938_vm7 = vcmp.lt.s32.totalorder %v1658_v31, 113  ;;  %vm1019_vm8 = vcmp.lt.s32.totalorder %v1658_v31, 112  ;;  %vm1100_vm9 = vcmp.lt.s32.totalorder %v1658_v31, 111 }
 0x12b   : > { %1369 = vset.pattern.permute.xlu1 %v1424_v32  ;;  %v1661_v32 = vsub.s32 0, %v1561_v44 }
 0x12c   : > { %572 = vperm.xlu1 %1369, %v1531_v14   ;;  %v1641_v23 = vpop.permute.xlu0 %605 }
 0x130   : > { %1371 = vset.pattern.permute.xlu1 %v1425_v33  ;;  %v1666_v33 = vld [vmem:[%s1964_s5] sm:$0xff] }
 0x131   : > { %621 = vperm.xlu1 %1371, %v1531_v14   ;;  %v1645_v25 = vpop.permute.xlu0 %653 }
 0x135   : > { %1372 = vset.pattern.permute.xlu1 %v1426_v34  ;;  %v1671_v34 = vld [vmem:[%s1964_s5 + $0x8] sm:$0xff] }
 0x136   : > { %637 = vperm.xlu1 %1372, %v1531_v14  }
 0x13a   : > { %1375 = vset.pattern.permute.xlu1 %v1427_v35 }
 0x13b   : > { %702 = vperm.xlu1 %1375, %v1531_v14  }
 0x13f   : > { %1376 = vset.pattern.permute.xlu1 %v1428_v36  ;;  %v1676_v36 = vsub.s32 1, %v1561_v44 }
 0x140   : > { %718 = vperm.xlu1 %1376, %v1531_v14  }
 0x141   : > { %v516_v40 = vrot.slane %v1666_v33, %v1676_v36  ;;  %v520_v41 = vrot.slane %v1671_v34, %v1676_v36 }
 0x144   : > { %1378 = vset.pattern.permute.xlu1 %v1429_v37 }
 0x145   : > { %750 = vperm.xlu1 %1378, %v1531_v14  }
 0x149   : > { %1379 = vset.pattern.permute.xlu1 %v1430_v38  ;;  %v434_v38 = vrot.slane %v1666_v33, %v1661_v32 }
 0x14a   : > { %776 = vperm.xlu1 %1379, %v1531_v14  }
 0x14e   : > { %1381 = vset.pattern.permute.xlu1 %v1431_v39  ;;  %v438_v39 = vrot.slane %v1671_v34, %v1661_v32 }
 0x18a   : > { %v377_v46 = vpop.permute.xlu1 %376 }
 0x18b   : > { %v384_v47 = vrot.slane %v377_v46, %v383_v45 }
 0x18d   : > { %v386_v50 = vmul.f32 %v384_v47, %v373_v48 }
 0x18e   : > { %v390_v49 = vpop.permute.xlu1 %389 }
 0x18f   : > { %v397_v51 = vrot.slane %v390_v49, %v383_v45 }
 0x191   : > { %v399_v52 = vadd.f32 %v397_v51, %v386_v50  ;;  %v1689_v50 = vsub.s32 2, %v1561_v44  ;;  %v1692_v51 = vsub.s32 3, %v1561_v44 }
 0x193   : > { %vm401_vm1 = vcmp.ge.f32.partialorder %v399_v52, 0.0  ;;  %v411_v54 = vmul.f32 %v409_v53, %v399_v52  ;;  %v1607_v5 = vpop.permute.xlu1 %459 }
 0x195   : > { %v1570_v55 = vsel %vm401_vm1, %v399_v52, %v411_v54 }
 0x196   : > { %587 = vrot.lane.b32.xlu0 %v1570_v55, %s1433_s29  ;;  %422 = vrot.lane.b32.xlu1 %v1570_v55, %s1434_s30  ;;  %v1577_v56 = vcombine.high %v1570_v55, %v1570_v55 }
 0x198   : > { %v1612_v7 = vpop.permute.xlu1 %491 }
 0x19a   : > { %506 = vrot.lane.b32.xlu1 %v1570_v55, %s1435_s10  ;;  %508 = vrot.lane.b32.xlu0 %v1577_v56, %s1435_s10 }
 0x19d   : > { %v1615_v8 = vpop.permute.xlu1 %524 }
 0x19e   : > { %668 = vrot.lane.b32.xlu1 %v1570_v55, %s1410_s16  ;;  %802 = vperm.xlu0 %1380, %v1531_v14  }
 0x1a2   : > { %1383 = vset.pattern.permute.xlu0 %v1436_v57  ;;  %424 = vrot.lane.b32.xlu1 %v1577_v56, %s1434_s30  ;;  %v1620_v10 = vpop.permute.xlu1 %556  ;;  %s1302_s30 = sshll.u32 %s1972_s12, 2 }
 0x1a3   : > { %887 = vperm.xlu0 %1383, %v1531_v14  }
 0x1a6   : > { %828 = vperm.xlu1 %1381, %v1531_v14  }
 0x1a7   : > { %934 = vrot.lane.b32.xlu0 %v1570_v55, %s1437_s13  ;;  %v1623_v13 = vpop.permute.xlu1 %572 }
 0x1a8   : > { %1386 = vset.pattern.permute.xlu0 %v1438_v58 }
 0x1aa   : > { %853 = vrot.lane.b32.xlu1 %v1570_v55, %s1412_s17 }
 0x1ab   : > { %952 = vperm.xlu0 %1386, %v1531_v14   ;;  %1382 = vset.pattern.permute.xlu1 %v1439_v59 }
 0x1ac   : > { %v1627_v16 = vpop.permute.xlu1 %621 }
 0x1ae   : > { %871 = vperm.xlu1 %1382, %v1531_v14  }
 0x1af   : > { %855 = vrot.lane.b32.xlu0 %v1577_v56, %s1412_s17 }
 0x1b0   : > { %1389 = vset.pattern.permute.xlu0 %v1440_v60 }
 0x1b1   : > { %v1630_v19 = vpop.permute.xlu1 %637 }
 0x1b2   : > { %1384 = vset.pattern.permute.xlu1 %v1441_v61 }
 0x1b3   : > { %903 = vperm.xlu1 %1384, %v1531_v14   ;;  %1000 = vperm.xlu0 %1389, %v1531_v14  }
 0x1b6   : > { %v1639_v22 = vpop.permute.xlu1 %702 }
 0x1b7   : > { %589 = vrot.lane.b32.xlu1 %v1577_v56, %s1433_s29  ;;  %1390 = vset.pattern.permute.xlu0 %v1442_v62  ;;  %s343_s29 = scalar_lea.vmem %s1967_s8, %s1299_s25 }
 0x1b8   : > { %1385 = vset.pattern.permute.xlu1 %v1443_v63  ;;  %1033 = vperm.xlu0 %1390, %v1531_v14  }
 0x1bb   : > { %919 = vperm.xlu1 %1385, %v1531_v14   ;;  %v1643_v24 = vpop.permute.xlu1 %718 }
 0x1bc   : > { %1393 = vset.pattern.permute.xlu0 %v1444_v0 }
 0x1bd   : > { %1081 = vperm.xlu0 %1393, %v1531_v14  }
 0x1bf   : > { %670 = vrot.lane.b32.xlu1 %v1577_v56, %s1410_s16 }
 0x1c0   : > { %1387 = vset.pattern.permute.xlu1 %v1445_v1  ;;  %v1647_v26 = vpop.permute.xlu1 %750 }
 0x1c1   : > { %1394 = vset.pattern.permute.xlu0 %v1446_v2 }
 0x1c2   : > { %1114 = vperm.xlu0 %1394, %v1531_v14  }
 0x1c3   : > { %968 = vperm.xlu1 %1387, %v1531_v14  }
 0x1c5   : > { %v1651_v27 = vpop.permute.xlu1 %776 }
 0x1c6   : > { %1397 = vset.pattern.permute.xlu0 %v1447_v3 }
 0x1c7   : > { %1388 = vset.pattern.permute.xlu1 %v1448_v4  ;;  %1162 = vperm.xlu0 %1397, %v1531_v14  }
 0x1c8   : > { %984 = vperm.xlu1 %1388, %v1531_v14  }
 0x1cb   : > { %1399 = vset.pattern.permute.xlu0 %v1411_v11 }
 0x1cc   : > { %1015 = vrot.lane.b32.xlu1 %v1570_v55, %s1449_s14 }
 0x1cd   : > { %1391 = vset.pattern.permute.xlu1 %v1450_v6 }
 0x1d0   : > { %1049 = vperm.xlu1 %1391, %v1531_v14  }
 0x1d4   : > { %1392 = vset.pattern.permute.xlu1 %v1451_v9 }
 0x1d5   : > { %1065 = vperm.xlu1 %1392, %v1531_v14  }
 0x1d9   : > { %936 = vrot.lane.b32.xlu1 %v1577_v56, %s1437_s13  ;;  %s348_s13 = scalar_lea.vmem %s1968_s9, %s1302_s30 }
 0x1da   : > { %1395 = vset.pattern.permute.xlu1 %v1452_v12 }
 0x1dd   : > { %1096 = vrot.lane.b32.xlu1 %v1570_v55, %s1453_s4 }
 0x1e1   : > { %1017 = vrot.lane.b32.xlu1 %v1577_v56, %s1449_s14 }
 0x1e5   : > { %1130 = vperm.xlu1 %1395, %v1531_v14  }
 0x1e9   : > { %1098 = vrot.lane.b32.xlu1 %v1577_v56, %s1453_s4 }
 0x1ea   : > { %1396 = vset.pattern.permute.xlu1 %v1454_v18 }
 0x1ed   : > { %1146 = vperm.xlu1 %1396, %v1531_v14   ;;  %v1649_v14 = vpop.permute.xlu0 %686 }
 0x1f1   : > { %1398 = vset.pattern.permute.xlu1 %v1411_v11  ;;  %v1653_v28 = vpop.permute.xlu0 %734 }
 0x1f2   : > { %1179 = vperm.xlu1 %1398, %v418_v21  }
 0x208   : > { %v423_v29 = vpop.permute.xlu1 %422  ;;  %v1655_v30 = vpop.permute.xlu0 %587 }
 0x20c   : > { %v507_v11 = vpop.permute.xlu1 %506  ;;  %v509_v37 = vpop.permute.xlu0 %508 }
 0x20d   : > { %v511_v42 = vsel %vm510_vm2, %v507_v11, %v509_v37  ;;  %v512_v43 = vsel %vm510_vm2, %v509_v37, %v507_v11 }
 0x20e   : > { %v1694_v52 = vmul.f32 %v516_v40, %v512_v43  ;;  %v1696_v53 = vmul.f32 %v520_v41, %v511_v42 }
 0x210   : > { %v1673_v35 = vpop.permute.xlu1 %668  ;;  %v530_v3 = vrot.slane %v1694_v52, %v1661_v32  ;;  %v534_v4 = vrot.slane %v1696_v53, %v1661_v32  ;;  %v546_v21 = vrot.slane %v1694_v52, %v1676_v36 }
 0x212   : > { %v536_v40 = vmul.f32 %v534_v4, %v1615_v8 }
 0x214   : > { %v425_v45 = vpop.permute.xlu1 %424 }
 0x215   : > { %v429_v46 = vsel %vm428_vm3, %v423_v29, %v425_v45  ;;  %v430_v47 = vsel %vm428_vm3, %v425_v45, %v423_v29  ;;  %v551_v45 = vmul.f32 %v546_v21, %v1633_v20 }
 0x216   : > { %v439_v48 = vmul.f32 %v434_v38, %v430_v47  ;;  %v440_v49 = vmul.f32 %v438_v39, %v429_v46  ;;  %v562_v38 = vrot.slane %v1694_v52, %v1689_v50  ;;  %v566_v39 = vrot.slane %v1696_v53, %v1689_v50 }
 0x218   : > { %v449_v54 = vrot.slane %v439_v48, %v1661_v32  ;;  %v453_v56 = vrot.slane %v440_v49, %v1661_v32  ;;  %v465_v57 = vrot.slane %v439_v48, %v1676_v36  ;;  %v469_v58 = vrot.slane %v440_v49, %v1676_v36 }
 0x219   : > { %v481_v59 = vrot.slane %v439_v48, %v1689_v50  ;;  %v485_v60 = vrot.slane %v440_v49, %v1689_v50  ;;  %v497_v61 = vrot.slane %v439_v48, %v1692_v51  ;;  %v501_v62 = vrot.slane %v440_v49, %v1692_v51 }
 0x21a   : > { %v454_v63 = vmul.f32 %v449_v54, %v444_v15  ;;  %v455_v0 = vmul.f32 %v453_v56, %v444_v15  ;;  %v470_v1 = vmul.f32 %v465_v57, %v1607_v5  ;;  %v471_v2 = vmul.f32 %v469_v58, %v1607_v5 }
 0x21b   : > { %v486_v12 = vmul.f32 %v481_v59, %v476_v17  ;;  %v487_v18 = vmul.f32 %v485_v60, %v476_v17  ;;  %v550_v15 = vrot.slane %v1696_v53, %v1676_v36  ;;  %v502_v5 = vmul.f32 %v497_v61, %v1612_v7  ;;  %v1734_v60 = vpop.permute.xlu0 %802 }
 0x21c   : > { %v472_v6 = vadd.f32 %v470_v1, %v454_v63  ;;  %v473_v9 = vadd.f32 %v471_v2, %v455_v0  ;;  %v503_v37 = vmul.f32 %v501_v62, %v1612_v7  ;;  %v535_v17 = vmul.f32 %v530_v3, %v1615_v8 }
 0x21d   : > { %v552_v46 = vmul.f32 %v550_v15, %v1633_v20  ;;  %v567_v48 = vmul.f32 %v562_v38, %v1620_v10  ;;  %v568_v49 = vmul.f32 %v566_v39, %v1620_v10  ;;  %v597_v20 = vrot.slane %v1666_v33, %v1689_v50 }
 0x21e   : > { %v488_v29 = vadd.f32 %v486_v12, %v472_v6  ;;  %v489_v11 = vadd.f32 %v487_v18, %v473_v9  ;;  %v601_v10 = vrot.slane %v1671_v34, %v1689_v50  ;;  %v578_v63 = vrot.slane %v1694_v52, %v1692_v51 }
 0x21f   : > { %v1738_v62 = vpop.permute.xlu0 %887  ;;  %v582_v0 = vrot.slane %v1696_v53, %v1692_v51  ;;  %v759_v2 = vsub.s32 4, %v1561_v44  ;;  %v1751_v3 = vsub.s32 5, %v1561_v44  ;;  %v1756_v9 = vsub.s32 6, %v1561_v44 }
 0x220   : > { %v504_v41 = vadd.f32 %v502_v5, %v488_v29  ;;  %v505_v42 = vadd.f32 %v503_v37, %v489_v11  ;;  %v1759_v12 = vsub.s32 7, %v1561_v44  ;;  %v756_v53 = vrot.slane %v1570_v55, %v1661_v32 }
 0x221   : > { %v1724_v43 = vpop.permute.xlu1 %828  ;;  %v583_v21 = vmul.f32 %v578_v63, %v1623_v13  ;;  %v584_v15 = vmul.f32 %v582_v0, %v1623_v13  ;;  %v678_v13 = vrot.slane %v1666_v33, %v1692_v51 }
 0x222   : > { %v537_v47 = vadd.f32 %v535_v17, %v504_v41  ;;  %v538_v7 = vadd.f32 %v536_v40, %v505_v42  ;;  %v682_v17 = vrot.slane %v1671_v34, %v1692_v51 }
 0x223   : > { %v1766_v29 = vpop.permute.xlu0 %934 }
 0x224   : > { %v553_v54 = vadd.f32 %v551_v45, %v537_v47  ;;  %v554_v56 = vadd.f32 %v552_v46, %v538_v7  ;;  %v1783_v46 = vrot.slane %v1570_v55, %v759_v2  ;;  %v782_v47 = vrot.slane %v1570_v55, %v1676_v36 }
 0x225   : > { %v1730_v57 = vpop.permute.xlu1 %853 }
 0x226   : > { %v569_v58 = vadd.f32 %v567_v48, %v553_v54  ;;  %v570_v8 = vadd.f32 %v568_v49, %v554_v56 }
 0x227   : > { %v1799_v0 = vpop.permute.xlu0 %952 }
 0x228   : > { %v585_v40 = vadd.f32 %v583_v21, %v569_v58  ;;  %v586_v41 = vadd.f32 %v584_v15, %v570_v8 }
 0x229   : > { %v1732_v59 = vpop.permute.xlu1 %871 }
 0x22e   : > { %v1736_v61 = vpop.permute.xlu1 %903 }
 0x232   : > { %v590_v1 = vpop.permute.xlu1 %589 }
 0x233   : > { %v592_v4 = vsel %vm591_vm4, %v1655_v30, %v590_v1  ;;  %v593_v6 = vsel %vm591_vm4, %v590_v1, %v1655_v30 }
 0x234   : > { %v602_v52 = vmul.f32 %v597_v20, %v593_v6  ;;  %v603_v18 = vmul.f32 %v601_v10, %v592_v4 }
 0x236   : > { %v611_v30 = vrot.slane %v602_v52, %v1661_v32  ;;  %v615_v11 = vrot.slane %v603_v18, %v1661_v32  ;;  %v627_v44 = vrot.slane %v602_v52, %v1676_v36  ;;  %v631_v5 = vrot.slane %v603_v18, %v1676_v36  ;;  %v1772_v37 = vpop.permute.xlu1 %919 }
 0x237   : > { %v643_v38 = vrot.slane %v602_v52, %v1689_v50  ;;  %v647_v39 = vrot.slane %v603_v18, %v1689_v50  ;;  %v659_v7 = vrot.slane %v602_v52, %v1692_v51  ;;  %v663_v48 = vrot.slane %v603_v18, %v1692_v51 }
 0x238   : > { %v616_v42 = vmul.f32 %v611_v30, %v1641_v23  ;;  %v617_v45 = vmul.f32 %v615_v11, %v1641_v23  ;;  %v632_v56 = vmul.f32 %v627_v44, %v1627_v16  ;;  %v633_v58 = vmul.f32 %v631_v5, %v1627_v16 }
 0x239   : > { %v648_v20 = vmul.f32 %v643_v38, %v1630_v19  ;;  %v649_v23 = vmul.f32 %v647_v39, %v1630_v19  ;;  %v786_v16 = vrot.slane %v1570_v55, %v1751_v3  ;;  %v808_v19 = vrot.slane %v1570_v55, %v1689_v50 }
 0x23a   : > { %v618_v49 = vadd.f32 %v616_v42, %v585_v40  ;;  %v619_v54 = vadd.f32 %v617_v45, %v586_v41  ;;  %v671_v8 = vpop.permute.xlu1 %670  ;;  %v664_v52 = vmul.f32 %v659_v7, %v1645_v25  ;;  %v665_v18 = vmul.f32 %v663_v48, %v1645_v25  ;;  %v856_v7 = vpop.permute.xlu0 %855 }
 0x23b   : > { %v673_v10 = vsel %vm672_vm5, %v1673_v35, %v671_v8  ;;  %v674_v63 = vsel %vm672_vm5, %v671_v8, %v1673_v35  ;;  %v812_v41 = vrot.slane %v1570_v55, %v1756_v9  ;;  %v863_v8 = vrot.slane %v1666_v33, %v1751_v3 }
 0x23c   : > { %v634_v1 = vadd.f32 %v632_v56, %v618_v49  ;;  %v635_v2 = vadd.f32 %v633_v58, %v619_v54  ;;  %v683_v4 = vmul.f32 %v678_v13, %v674_v63  ;;  %v684_v6 = vmul.f32 %v682_v17, %v673_v10 }
 0x23d   : > { %v766_v58 = vrot.slane %v756_v53, %v1661_v32  ;;  %v834_v53 = vrot.slane %v1570_v55, %v1692_v51 }
 0x23e   : > { %v650_v21 = vadd.f32 %v648_v20, %v634_v1  ;;  %v651_v15 = vadd.f32 %v649_v23, %v635_v2  ;;  %v692_v35 = vrot.slane %v683_v4, %v1661_v32  ;;  %v696_v30 = vrot.slane %v684_v6, %v1661_v32  ;;  %v1809_v11 = vpop.permute.xlu1 %968 }
 0x23f   : > { %v708_v44 = vrot.slane %v683_v4, %v1676_v36  ;;  %v712_v5 = vrot.slane %v684_v6, %v1676_v36  ;;  %v724_v38 = vrot.slane %v683_v4, %v1689_v50  ;;  %v728_v39 = vrot.slane %v684_v6, %v1689_v50 }
 0x240   : > { %v666_v13 = vadd.f32 %v664_v52, %v650_v21  ;;  %v667_v17 = vadd.f32 %v665_v18, %v651_v15  ;;  %v697_v25 = vmul.f32 %v692_v35, %v1649_v14  ;;  %v698_v40 = vmul.f32 %v696_v30, %v1649_v14 }
 0x241   : > { %v713_v42 = vmul.f32 %v708_v44, %v1639_v22  ;;  %v714_v45 = vmul.f32 %v712_v5, %v1639_v22  ;;  %v740_v54 = vrot.slane %v683_v4, %v1692_v51  ;;  %v744_v56 = vrot.slane %v684_v6, %v1692_v51 }
 0x242   : > { %v699_v48 = vadd.f32 %v697_v25, %v666_v13  ;;  %v700_v49 = vadd.f32 %v698_v40, %v667_v17  ;;  %v770_v14 = vrot.slane %v1783_v46, %v1661_v32  ;;  %v867_v20 = vrot.slane %v1671_v34, %v1751_v3 }
 0x243   : > { %v1831_v23 = vpop.permute.xlu1 %984  ;;  %v729_v63 = vmul.f32 %v724_v38, %v1643_v24  ;;  %v730_v1 = vmul.f32 %v728_v39, %v1643_v24  ;;  %v838_v46 = vrot.slane %v1570_v55, %v1759_v12  ;;  %v858_v2 = vsel %vm857_vm6, %v1730_v57, %v856_v7 }
 0x244   : > { %v715_v22 = vadd.f32 %v713_v42, %v699_v48  ;;  %v716_v10 = vadd.f32 %v714_v45, %v700_v49  ;;  %v859_v3 = vsel %vm857_vm6, %v856_v7, %v1730_v57  ;;  %v745_v52 = vmul.f32 %v740_v54, %v1653_v28 }
 0x245   : > { %v746_v24 = vmul.f32 %v744_v56, %v1653_v28  ;;  %v771_v18 = vmul.f32 %v766_v58, %v1647_v26  ;;  %v772_v21 = vmul.f32 %v770_v14, %v1647_v26  ;;  %v792_v55 = vrot.slane %v782_v47, %v1676_v36 }
 0x246   : > { %v731_v4 = vadd.f32 %v729_v63, %v715_v22  ;;  %v732_v6 = vadd.f32 %v730_v1, %v716_v10  ;;  %v796_v15 = vrot.slane %v786_v16, %v1676_v36  ;;  %v868_v30 = vmul.f32 %v863_v8, %v858_v2 }
 0x247   : > { %v1851_v35 = vpop.permute.xlu1 %1015  ;;  %v869_v44 = vmul.f32 %v867_v20, %v859_v3  ;;  %v818_v38 = vrot.slane %v808_v19, %v1689_v50  ;;  %v822_v39 = vrot.slane %v812_v41, %v1689_v50  ;;  %v797_v28 = vmul.f32 %v792_v55, %v1651_v27 }
 0x248   : > { %v747_v5 = vadd.f32 %v745_v52, %v731_v4  ;;  %v748_v57 = vadd.f32 %v746_v24, %v732_v6  ;;  %v798_v13 = vmul.f32 %v796_v15, %v1651_v27  ;;  %v844_v25 = vrot.slane %v834_v53, %v1692_v51 }
 0x249   : > { %v823_v47 = vmul.f32 %v818_v38, %v1734_v60  ;;  %v824_v16 = vmul.f32 %v822_v39, %v1734_v60  ;;  %v848_v40 = vrot.slane %v838_v46, %v1692_v51  ;;  %v877_v19 = vrot.slane %v868_v30, %v1661_v32 }
 0x24a   : > { %v773_v17 = vadd.f32 %v771_v18, %v747_v5  ;;  %v774_v26 = vadd.f32 %v772_v21, %v748_v57  ;;  %v881_v41 = vrot.slane %v869_v44, %v1661_v32  ;;  %v849_v27 = vmul.f32 %v844_v25, %v1724_v43 }
 0x24b   : > { %v1861_v42 = vpop.permute.xlu1 %1049  ;;  %v850_v48 = vmul.f32 %v848_v40, %v1724_v43  ;;  %v893_v49 = vrot.slane %v868_v30, %v1676_v36  ;;  %v897_v60 = vrot.slane %v869_v44, %v1676_v36  ;;  %v909_v58 = vrot.slane %v868_v30, %v1689_v50 }
 0x24c   : > { %v799_v45 = vadd.f32 %v797_v28, %v773_v17  ;;  %v800_v7 = vadd.f32 %v798_v13, %v774_v26  ;;  %v913_v14 = vrot.slane %v869_v44, %v1689_v50  ;;  %v882_v8 = vmul.f32 %v877_v19, %v1732_v59 }
 0x24d   : > { %v883_v20 = vmul.f32 %v881_v41, %v1732_v59  ;;  %v944_v43 = vrot.slane %v1666_v33, %v1756_v9  ;;  %v948_v1 = vrot.slane %v1671_v34, %v1756_v9  ;;  %v898_v53 = vmul.f32 %v893_v49, %v1738_v62 }
 0x24e   : > { %v825_v54 = vadd.f32 %v823_v47, %v799_v45  ;;  %v826_v56 = vadd.f32 %v824_v16, %v800_v7  ;;  %v899_v46 = vmul.f32 %v897_v60, %v1738_v62  ;;  %v914_v59 = vmul.f32 %v909_v58, %v1736_v61  ;;  %v1001_v62 = vpop.permute.xlu0 %1000 }
 0x24f   : > { %v915_v4 = vmul.f32 %v913_v14, %v1736_v61  ;;  %v925_v18 = vrot.slane %v868_v30, %v1692_v51  ;;  %v929_v21 = vrot.slane %v869_v44, %v1692_v51  ;;  %v1025_v47 = vrot.slane %v1666_v33, %v1759_v12 }
 0x250   : > { %v1873_v22 = vpop.permute.xlu1 %1065  ;;  %v851_v10 = vadd.f32 %v849_v27, %v825_v54  ;;  %v852_v63 = vadd.f32 %v850_v48, %v826_v56 }
 0x251   : > { %v930_v39 = vmul.f32 %v925_v18, %v1772_v37  ;;  %v931_v61 = vmul.f32 %v929_v21, %v1772_v37  ;;  %v1029_v37 = vrot.slane %v1671_v34, %v1759_v12 }
 0x252   : > { %v884_v2 = vadd.f32 %v882_v8, %v851_v10  ;;  %v885_v3 = vadd.f32 %v883_v20, %v852_v63  ;;  %v1034_v60 = vpop.permute.xlu0 %1033 }
 0x254   : > { %v937_v6 = vpop.permute.xlu1 %936  ;;  %v900_v52 = vadd.f32 %v898_v53, %v884_v2  ;;  %v901_v24 = vadd.f32 %v899_v46, %v885_v3 }
 0x255   : > { %v939_v55 = vsel %vm938_vm7, %v1766_v29, %v937_v6  ;;  %v940_v9 = vsel %vm938_vm7, %v937_v6, %v1766_v29 }
 0x256   : > { %v949_v15 = vmul.f32 %v944_v43, %v939_v55  ;;  %v950_v5 = vmul.f32 %v948_v1, %v940_v9  ;;  %v916_v57 = vadd.f32 %v914_v59, %v900_v52  ;;  %v917_v38 = vadd.f32 %v915_v4, %v901_v24  ;;  %v1082_v52 = vpop.permute.xlu0 %1081 }
 0x258   : > { %v958_v28 = vrot.slane %v949_v15, %v1661_v32  ;;  %v962_v30 = vrot.slane %v950_v5, %v1661_v32  ;;  %v974_v44 = vrot.slane %v949_v15, %v1676_v36  ;;  %v978_v13 = vrot.slane %v950_v5, %v1676_v36  ;;  %v1097_v29 = vpop.permute.xlu1 %1096 }
 0x259   : > { %v990_v17 = vrot.slane %v949_v15, %v1689_v50  ;;  %v994_v26 = vrot.slane %v950_v5, %v1689_v50  ;;  %v932_v16 = vadd.f32 %v930_v39, %v916_v57  ;;  %v933_v25 = vadd.f32 %v931_v61, %v917_v38 }
 0x25a   : > { %v963_v40 = vmul.f32 %v958_v28, %v1799_v0  ;;  %v964_v19 = vmul.f32 %v962_v30, %v1799_v0  ;;  %v1006_v41 = vrot.slane %v949_v15, %v1692_v51  ;;  %v1010_v45 = vrot.slane %v950_v5, %v1692_v51  ;;  %v1304_v5 = vld [vmem:[%s1964_s5 + $0x10] ss:$0 sm:$0xff] }
 0x25b   : > { %v979_v48 = vmul.f32 %v974_v44, %v1809_v11  ;;  %v980_v49 = vmul.f32 %v978_v13, %v1809_v11  ;;  %v995_v34 = vmul.f32 %v990_v17, %v1831_v23  ;;  %v996_v12 = vmul.f32 %v994_v26, %v1831_v23 }
 0x25c   : > { %v965_v7 = vadd.f32 %v963_v40, %v932_v16  ;;  %v966_v27 = vadd.f32 %v964_v19, %v933_v25  ;;  %v1018_v33 = vpop.permute.xlu1 %1017  ;;  %v1011_v20 = vmul.f32 %v1006_v41, %v1001_v62  ;;  %v1012_v11 = vmul.f32 %v1010_v45, %v1001_v62  ;;  %v1305_v62 = vld [vmem:[%s1964_s5 + $0x18] ss:$0 sm:$0xff]  ;;  %v1115_v16 = vpop.permute.xlu0 %1114 }
 0x25d   : > { %v1020_v0 = vsel %vm1019_vm8, %v1851_v35, %v1018_v33  ;;  %v1021_v54 = vsel %vm1019_vm8, %v1018_v33, %v1851_v35 }
 0x25e   : > { %v981_v56 = vadd.f32 %v979_v48, %v965_v7  ;;  %v982_v58 = vadd.f32 %v980_v49, %v966_v27  ;;  %v1030_v14 = vmul.f32 %v1025_v47, %v1020_v0  ;;  %v1031_v8 = vmul.f32 %v1029_v37, %v1021_v54 }
 0x260   : > { %v997_v10 = vadd.f32 %v995_v34, %v981_v56  ;;  %v998_v63 = vadd.f32 %v996_v12, %v982_v58  ;;  %v1039_v23 = vrot.slane %v1030_v14, %v1661_v32  ;;  %v1043_v43 = vrot.slane %v1031_v8, %v1661_v32  ;;  %v1131_v1 = vpop.permute.xlu1 %1130  ;;  %v1163_v0 = vpop.permute.xlu0 %1162 }
 0x261   : > { %v1055_v53 = vrot.slane %v1030_v14, %v1676_v36  ;;  %v1059_v46 = vrot.slane %v1031_v8, %v1676_v36  ;;  %v1071_v35 = vrot.slane %v1030_v14, %v1689_v50  ;;  %v1075_v2 = vrot.slane %v1031_v8, %v1689_v50 }
 0x262   : > { %v1013_v3 = vadd.f32 %v1011_v20, %v997_v10  ;;  %v1014_v59 = vadd.f32 %v1012_v11, %v998_v63  ;;  %v1044_v4 = vmul.f32 %v1039_v23, %v1034_v60  ;;  %v1045_v6 = vmul.f32 %v1043_v43, %v1034_v60 }
 0x263   : > { %v1060_v24 = vmul.f32 %v1055_v53, %v1861_v42  ;;  %v1061_v18 = vmul.f32 %v1059_v46, %v1861_v42  ;;  %v1087_v9 = vrot.slane %v1030_v14, %v1692_v51  ;;  %v1091_v15 = vrot.slane %v1031_v8, %v1692_v51 }
 0x264   : > { %v1046_v21 = vadd.f32 %v1044_v4, %v1013_v3  ;;  %v1047_v55 = vadd.f32 %v1045_v6, %v1014_v59  ;;  %v1099_v57 = vpop.permute.xlu1 %1098  ;;  %v1076_v28 = vmul.f32 %v1071_v35, %v1873_v22  ;;  %v1077_v30 = vmul.f32 %v1075_v2, %v1873_v22 }
 0x265   : > { %v1101_v38 = vsel %vm1100_vm9, %v1097_v29, %v1099_v57  ;;  %v1102_v42 = vsel %vm1100_vm9, %v1099_v57, %v1097_v29  ;;  %v1092_v47 = vmul.f32 %v1087_v9, %v1082_v52  ;;  %v1093_v37 = vmul.f32 %v1091_v15, %v1082_v52 }
 0x266   : > { %v1062_v39 = vadd.f32 %v1060_v24, %v1046_v21  ;;  %v1063_v61 = vadd.f32 %v1061_v18, %v1047_v55  ;;  %v1111_v44 = vmul.f32 %v1304_v5, %v1101_v38  ;;  %v1112_v13 = vmul.f32 %v1305_v62, %v1102_v42 }
 0x268   : > { %v1078_v17 = vadd.f32 %v1076_v28, %v1062_v39  ;;  %v1079_v26 = vadd.f32 %v1077_v30, %v1063_v61  ;;  %v1120_v25 = vrot.slane %v1111_v44, %v1661_v32  ;;  %v1124_v40 = vrot.slane %v1112_v13, %v1661_v32  ;;  %v1147_v33 = vpop.permute.xlu1 %1146 }
 0x269   : > { %v1136_v29 = vrot.slane %v1111_v44, %v1676_v36  ;;  %v1140_v41 = vrot.slane %v1112_v13, %v1676_v36  ;;  %v1168_v22 = vrot.slane %v1111_v44, %v1692_v51  ;;  %v1172_v27 = vrot.slane %v1112_v13, %v1692_v51 }
 0x26a   : > { %v1094_v19 = vadd.f32 %v1092_v47, %v1078_v17  ;;  %v1095_v31 = vadd.f32 %v1093_v37, %v1079_v26  ;;  %v1125_v45 = vmul.f32 %v1120_v25, %v1115_v16  ;;  %v1126_v7 = vmul.f32 %v1124_v40, %v1115_v16 }
 0x26b   : > { %v1152_v48 = vrot.slane %v1111_v44, %v1689_v50  ;;  %v1156_v49 = vrot.slane %v1112_v13, %v1689_v50  ;;  %v1141_v32 = vmul.f32 %v1136_v29, %v1131_v1  ;;  %v1142_v12 = vmul.f32 %v1140_v41, %v1131_v1 }
 0x26c   : > { %v1127_v60 = vadd.f32 %v1125_v45, %v1094_v19  ;;  %v1128_v34 = vadd.f32 %v1126_v7, %v1095_v31  ;;  %v1173_v14 = vmul.f32 %v1168_v22, %v1163_v0  ;;  %v1174_v8 = vmul.f32 %v1172_v27, %v1163_v0 }
 0x26d   : > { %v1157_v36 = vmul.f32 %v1152_v48, %v1147_v33  ;;  %v1158_v58 = vmul.f32 %v1156_v49, %v1147_v33  ;;  %v1180_v51 = vpop.permute.xlu1 %1179 }
 0x26e   : > { %v1143_v54 = vadd.f32 %v1141_v32, %v1127_v60  ;;  %v1144_v56 = vadd.f32 %v1142_v12, %v1128_v34 }
 0x270   : > { %v1159_v20 = vadd.f32 %v1157_v36, %v1143_v54  ;;  %v1160_v11 = vadd.f32 %v1158_v58, %v1144_v56 }
 0x272   : > { %v1175_v10 = vadd.f32 %v1173_v14, %v1159_v20  ;;  %v1176_v63 = vadd.f32 %v1174_v8, %v1160_v11 }
 0x274   : > { %v1182_v50 = vadd.f32 %v1180_v51, %v1175_v10  ;;  %v1183_v23 = vadd.f32 %v1180_v51, %v1176_v63 }
 0x276   : > { %v1186_v43 = vcombine.low %v1182_v50, %v1183_v23  ;;  %v1190_v1 = vsel %vm1189_vm10, %v1182_v50, 0.0  ;;  %v1191_v53 = vsel %vm1189_vm10, %v1183_v23, 0.0  ;;  %v1197_v46 = vmul.f32 %v1182_v50, %v1182_v50 }
 0x277   : > { %v1192_v35 = vadd.f32 %v1191_v53, %v1190_v1  ;;  %v1198_v2 = vmul.f32 %v1183_v23, %v1183_v23 }
 0x278   : > { %1188 = vst [vmem:[%s343_s29] sm:$0xff] %v1186_v43  ;;  %v1199_v3 = vsel %vm1189_vm10, %v1197_v46, 0.0 }
 0x279   : > { %1193 = vadd.xlane.f32.xlu1 %v1192_v35  ;;  %v1200_v59 = vsel %vm1189_vm10, %v1198_v2, 0.0 }
 0x27a   : > { %v1201_v4 = vadd.f32 %v1200_v59, %v1199_v3 }
 0x27c   : > { %1202 = vadd.xlane.f32.xlu0 %v1201_v4 }
 0x302   : > { %v1194_v6 = vpop.xlane.xlu1 %1193 }
 0x303   : > { %1196 = vst.msk [vmem:[%s348_s13] sm:$0xf] %vm1195_vm11, %v1194_v6 }
 0x305   : > { %v1203_v52 = vpop.xlane.xlu0 %1202 }
 0x306   : > { %1205 = vst.msk [vmem:[%s348_s13] sm:$0xf] %vm1204_vm12, %v1203_v52 }
 0x307 PF: > { %s22_s11 = sadd.s32 1, %s1408_s11  }
 0x308   : > { %p19_p5 = scmp.ge.s32.totalorder %s22_s11, 4  }
 0x30a   :  { %21 = sbr.rel (!%p19_p5) target bundleno = 3 (0x3), region = 94 }

</bundles_post_ra>
